<compile_context>
chip_gen: v7x
topology: tpu7x:2x2x1
jax: 0.10.0
libtpu: 0.0.40
codegen_flags: <defaults>
</compile_context>

<pallas_src>
import functools

import jax
import jax.numpy as jnp
from jax import lax
from jax.experimental import pallas as pl
from jax.experimental.pallas import tpu as pltpu

HIDDEN_SIZE = 128
INPUT_SIZE = 2
NUM_LAYERS = 1
OUTPUT_SIZE = 1

# Keep the pre-projected inputs vreg-resident while they fit in ~half the
# 256 KiB vector register file; otherwise fall back to a VMEM scratch buffer.
_VREG_RESIDENT_BYTES = 128 * 1024


def _sigmoid_via_tanh(x):
    # sigmoid(x) == 0.5 * tanh(0.5 * x) + 0.5 : one EUP push instead of
    # exp + reciprocal; mathematically identical to jax.nn.sigmoid.
    return 0.5 * jnp.tanh(0.5 * x) + 0.5


def _make_lstm_fc_kernel(T, B, H, inputs_in_vregs):
    """Builds the LSTM + FC kernel for static (T, B_pad, H)."""

    def kernel(x_ref, wih_ref, whh_ref, b_ref, wfc_ref, bfc_ref, out_ref,
               *scratch):
        # x_ref   : (T*B, I)  f32, time-major flattened (I == 2, unpadded)
        # wih_ref : (I, 4H)   f32  (W_ih^T)
        # whh_ref : (H, 4H)   f32 or bf16 (W_hh^T)
        # b_ref   : (1, 4H)   f32  (b_ih + b_hh)
        # wfc_ref : (H, 128)  f32  (fc.weight^T, zero-padded cols)
        # bfc_ref : (1, 128)  f32
        # out_ref : (B, 128)  f32

        # --- hoisted input projection: VPU broadcast-FMA, off the h-chain ---
        x = x_ref[...]
        inp2d = (x[:, 0:1] * wih_ref[0:1, :]
                 + x[:, 1:2] * wih_ref[1:2, :]
                 + b_ref[...])                                    # (T*B, 4H)

        def gate_math(pre, h, c):
            # PyTorch gate order: i, f, g, o
            i_g = _sigmoid_via_tanh(pre[:, 0 * H:1 * H])
            f_g = _sigmoid_via_tanh(pre[:, 1 * H:2 * H])
            g_g = jnp.tanh(pre[:, 2 * H:3 * H])
            o_g = _sigmoid_via_tanh(pre[:, 3 * H:4 * H])
            c_new = f_g * c + i_g * g_g
            h_new = o_g * jnp.tanh(c_new)
            return h_new, c_new

        # h0 = c0 = zeros (matches torch.zeros in forward()); carried in vregs.
        h = jnp.zeros((B, H), jnp.float32)
        c = jnp.zeros((B, H), jnp.float32)

        if inputs_in_vregs:
            # Static slices of the vreg-resident projection; fully unrolled so
            # Mosaic can keep W_hh staged in the MXU and interleave EUP/VALU
            # work of adjacent steps.  Only h @ W_hh is serially dependent.
            for tt in range(T):
                gates = inp2d[tt * B:(tt + 1) * B, :] + jnp.dot(
                    h.astype(whh_ref.dtype), whh_ref[...],
                    preferred_element_type=jnp.float32)
                h, c = gate_math(gates, h, c)
        else:
            # Larger T: round-trip the projection through VMEM scratch instead
            # of holding it all live in vregs.
            inp_scr = scratch[0]                                  # (T, B, 4H)
            for tt in range(T):
                inp_scr[tt] = inp2d[tt * B:(tt + 1) * B, :]

            def step(t, carry):
                hh, cc = carry
                gates = inp_scr[t] + jnp.dot(
                    hh.astype(whh_ref.dtype), whh_ref[...],
                    preferred_element_type=jnp.float32)
                return gate_math(gates, hh, cc)

            h, c = lax.fori_loop(0, T, step, (h, c), unroll=(T <= 16))

        # fc(out[:, -1, :]) -> lane-dense (B, 128) store.
        out_ref[...] = (
            jnp.dot(h, wfc_ref[...], preferred_element_type=jnp.float32)
            + bfc_ref[...]
        )

    return kernel


def prepare_soc_params(w_ih, w_hh, b_ih, b_hh, fc_w, fc_b, *,
                       recurrent_bf16=True):
    """One-time weight preprocessing, hoisted out of the per-call forward.

    w_ih: (4H, I), w_hh: (4H, H), b_ih/b_hh: (4H,), fc_w: (O, H), fc_b: (O,)
    """
    H = w_hh.shape[1]
    O = fc_w.shape[0]
    O_pad = 128                                      # lane-dense output store
    rec_dtype = jnp.bfloat16 if recurrent_bf16 else jnp.float32

    wih_t = jnp.asarray(w_ih, jnp.float32).T                       # (I, 4H)
    whh_t = jnp.asarray(w_hh, jnp.float32).T.astype(rec_dtype)     # (H, 4H)
    bias = (jnp.asarray(b_ih, jnp.float32)
            + jnp.asarray(b_hh, jnp.float32)).reshape(1, 4 * H)    # (1, 4H)
    wfc_t = jnp.pad(jnp.asarray(fc_w, jnp.float32).T,
                    ((0, 0), (0, O_pad - O)))                      # (H, 128)
    bfc = jnp.pad(jnp.asarray(fc_b, jnp.float32).reshape(1, O),
                  ((0, 0), (0, O_pad - O)))                        # (1, 128)
    return (wih_t, whh_t, bias, wfc_t, bfc)


@jax.jit
def soc_predictor_forward(x, params):
    """x: (B, T, INPUT_SIZE) float, batch-first like the PyTorch module."""
    wih_t, whh_t, bias, wfc_t, bfc = params
    B, T, I = x.shape
    H = whh_t.shape[0]
    O_pad = wfc_t.shape[1]
    B_pad = max(8, ((B + 7) // 8) * 8)       # sublane alignment for batch rows

    # --- glue: layout only (time-major, pad batch rows; no feature padding) ---
    x_tm = jnp.transpose(x.astype(jnp.float32), (1, 0, 2))         # (T, B, I)
    x_tm = jnp.pad(x_tm, ((0, 0), (0, B_pad - B), (0, 0)))         # (T, Bp, I)
    x_2d = x_tm.reshape(T * B_pad, I)                              # time-major flat

    inputs_in_vregs = (T * B_pad * 4 * H * 4) <= _VREG_RESIDENT_BYTES
    scratch = ([] if inputs_in_vregs
               else [pltpu.VMEM((T, B_pad, 4 * H), jnp.float32)])

    vmem = pl.BlockSpec(memory_space=pltpu.MemorySpace.VMEM)
    out = pl.pallas_call(
        _make_lstm_fc_kernel(T, B_pad, H, inputs_in_vregs),
        out_shape=jax.ShapeDtypeStruct((B_pad, O_pad), jnp.float32),
        in_specs=[vmem] * 6,
        out_specs=vmem,
        scratch_shapes=scratch,
    )(x_2d, wih_t, whh_t, bias, wfc_t, bfc)
    return out[:B, :OUTPUT_SIZE]


def _ref_forward(x, w_ih, w_hh, b_ih, b_hh, fc_w, fc_b):
    """Pure-JAX reference mirroring torch.nn.LSTM + Linear semantics."""
    B, T, _ = x.shape
    H = w_hh.shape[1]
    h = jnp.zeros((B, H), jnp.float32)
    c = jnp.zeros((B, H), jnp.float32)
    for t in range(T):
        gates = x[:, t, :] @ w_ih.T + h @ w_hh.T + b_ih + b_hh
        i_g = jax.nn.sigmoid(gates[:, 0 * H:1 * H])
        f_g = jax.nn.sigmoid(gates[:, 1 * H:2 * H])
        g_g = jnp.tanh(gates[:, 2 * H:3 * H])
        o_g = jax.nn.sigmoid(gates[:, 3 * H:4 * H])
        c = f_g * c + i_g * g_g
        h = o_g * jnp.tanh(c)
    return h @ fc_w.T + fc_b


if __name__ == "__main__":
    key = jax.random.PRNGKey(0)
    B, T = 8, 8
    H, I, O = HIDDEN_SIZE, INPUT_SIZE, OUTPUT_SIZE

    k = jax.random.split(key, 8)
    bound = 1.0 / jnp.sqrt(H)  # PyTorch default uniform init scale
    x = jax.random.normal(k[0], (B, T, I), jnp.float32)
    w_ih = jax.random.uniform(k[1], (4 * H, I), jnp.float32, -bound, bound)
    w_hh = jax.random.uniform(k[2], (4 * H, H), jnp.float32, -bound, bound)
    b_ih = jax.random.uniform(k[3], (4 * H,), jnp.float32, -bound, bound)
    b_hh = jax.random.uniform(k[4], (4 * H,), jnp.float32, -bound, bound)
    fc_w = jax.random.uniform(k[5], (O, H), jnp.float32, -bound, bound)
    fc_b = jax.random.uniform(k[6], (O,), jnp.float32, -bound, bound)

    ref = _ref_forward(x, w_ih, w_hh, b_ih, b_hh, fc_w, fc_b)

    # Exact-ish f32 recurrent path: tight tolerance vs the pure-XLA reference.
    params_f32 = prepare_soc_params(w_ih, w_hh, b_ih, b_hh, fc_w, fc_b,
                                    recurrent_bf16=False)
    out_f32 = jax.block_until_ready(soc_predictor_forward(x, params_f32))
    assert out_f32.shape == (B, O)
    assert jnp.allclose(out_f32, ref, atol=1e-4, rtol=1e-4), (out_f32, ref)

    # Default path: bf16 recurrent weights on the serial h @ W_hh MXU chain.
    params = prepare_soc_params(w_ih, w_hh, b_ih, b_hh, fc_w, fc_b)
    out_bf16 = jax.block_until_ready(soc_predictor_forward(x, params))
    assert out_bf16.shape == (B, O)
    assert jnp.allclose(out_bf16, ref, atol=5e-2, rtol=5e-2), (out_bf16, ref)

    print("KERNEL_OK")
</pallas_src>

<mosaic_0001>
module attributes {stable_mosaic.version = 11 : i64} {
  func.func @kernel(%arg0: memref<64x2xf32, #tpu.memory_space<vmem>>, %arg1: memref<2x512xf32, #tpu.memory_space<vmem>>, %arg2: memref<128x512xf32, #tpu.memory_space<vmem>>, %arg3: memref<1x512xf32, #tpu.memory_space<vmem>>, %arg4: memref<128x128xf32, #tpu.memory_space<vmem>>, %arg5: memref<1x128xf32, #tpu.memory_space<vmem>>, %arg6: memref<8x128xf32, #tpu.memory_space<vmem>>) attributes {dimension_semantics = [], scalar_prefetch = 0 : i64, scratch_operands = 0 : i64, tpu.core_type = #tpu.core_type<tc>} {
    %c0 = arith.constant 0 : index
    %c0_0 = arith.constant 0 : index
    %0 = vector.load %arg0[%c0, %c0_0] : memref<64x2xf32, #tpu.memory_space<vmem>>, vector<64x2xf32>
    %1 = vector.extract_strided_slice %0 {offsets = [0, 0], sizes = [64, 1], strides = [1, 1]} : vector<64x2xf32> to vector<64x1xf32>
    %c0_1 = arith.constant 0 : index
    %c0_2 = arith.constant 0 : index
    %2 = vector.load %arg1[%c0_1, %c0_2] : memref<2x512xf32, #tpu.memory_space<vmem>>, vector<1x512xf32>
    %3 = vector.broadcast %1 : vector<64x1xf32> to vector<64x512xf32>
    %4 = vector.broadcast %2 : vector<1x512xf32> to vector<64x512xf32>
    %5 = arith.mulf %3, %4 : vector<64x512xf32>
    %6 = vector.extract_strided_slice %0 {offsets = [0, 1], sizes = [64, 1], strides = [1, 1]} : vector<64x2xf32> to vector<64x1xf32>
    %c1 = arith.constant 1 : index
    %c0_3 = arith.constant 0 : index
    %7 = vector.load %arg1[%c1, %c0_3] : memref<2x512xf32, #tpu.memory_space<vmem>>, vector<1x512xf32>
    %8 = vector.broadcast %6 : vector<64x1xf32> to vector<64x512xf32>
    %9 = vector.broadcast %7 : vector<1x512xf32> to vector<64x512xf32>
    %10 = arith.mulf %8, %9 : vector<64x512xf32>
    %11 = arith.addf %5, %10 : vector<64x512xf32>
    %c0_4 = arith.constant 0 : index
    %c0_5 = arith.constant 0 : index
    %12 = vector.load %arg3[%c0_4, %c0_5] : memref<1x512xf32, #tpu.memory_space<vmem>>, vector<1x512xf32>
    %13 = vector.broadcast %12 : vector<1x512xf32> to vector<64x512xf32>
    %14 = arith.addf %11, %13 : vector<64x512xf32>
    %cst = arith.constant 0.000000e+00 : f32
    %15 = vector.broadcast %cst : f32 to vector<8x128xf32>
    %cst_6 = arith.constant 0.000000e+00 : f32
    %16 = vector.broadcast %cst_6 : f32 to vector<8x128xf32>
    %17 = vector.extract_strided_slice %14 {offsets = [0, 0], sizes = [8, 512], strides = [1, 1]} : vector<64x512xf32> to vector<8x512xf32>
    %c0_7 = arith.constant 0 : index
    %c0_8 = arith.constant 0 : index
    %18 = vector.load %arg2[%c0_7, %c0_8] : memref<128x512xf32, #tpu.memory_space<vmem>>, vector<128x512xf32>
    %cst_9 = arith.constant dense<0.000000e+00> : vector<8x512xf32>
    %19 = tpu.matmul %15, %18, %cst_9 {dimension_numbers = #tpu.dot_dimension_numbers<[1], [0], [0], [1], [0, 0, 1, 1], [], []>} : vector<8x128xf32>, vector<128x512xf32>, vector<8x512xf32> -> vector<8x512xf32>
    %20 = arith.addf %17, %19 : vector<8x512xf32>
    %21 = vector.extract_strided_slice %20 {offsets = [0, 0], sizes = [8, 128], strides = [1, 1]} : vector<8x512xf32> to vector<8x128xf32>
    %cst_10 = arith.constant 5.000000e-01 : f32
    %22 = vector.broadcast %cst_10 : f32 to vector<8x128xf32>
    %23 = arith.mulf %22, %21 : vector<8x128xf32>
    %24 = math.tanh %23 : vector<8x128xf32>
    %cst_11 = arith.constant 5.000000e-01 : f32
    %25 = vector.broadcast %cst_11 : f32 to vector<8x128xf32>
    %26 = arith.mulf %25, %24 : vector<8x128xf32>
    %cst_12 = arith.constant 5.000000e-01 : f32
    %27 = vector.broadcast %cst_12 : f32 to vector<8x128xf32>
    %28 = arith.addf %26, %27 : vector<8x128xf32>
    %29 = vector.extract_strided_slice %20 {offsets = [0, 128], sizes = [8, 128], strides = [1, 1]} : vector<8x512xf32> to vector<8x128xf32>
    %cst_13 = arith.constant 5.000000e-01 : f32
    %30 = vector.broadcast %cst_13 : f32 to vector<8x128xf32>
    %31 = arith.mulf %30, %29 : vector<8x128xf32>
    %32 = math.tanh %31 : vector<8x128xf32>
    %cst_14 = arith.constant 5.000000e-01 : f32
    %33 = vector.broadcast %cst_14 : f32 to vector<8x128xf32>
    %34 = arith.mulf %33, %32 : vector<8x128xf32>
    %cst_15 = arith.constant 5.000000e-01 : f32
    %35 = vector.broadcast %cst_15 : f32 to vector<8x128xf32>
    %36 = arith.addf %34, %35 : vector<8x128xf32>
    %37 = vector.extract_strided_slice %20 {offsets = [0, 256], sizes = [8, 128], strides = [1, 1]} : vector<8x512xf32> to vector<8x128xf32>
    %38 = math.tanh %37 : vector<8x128xf32>
    %39 = vector.extract_strided_slice %20 {offsets = [0, 384], sizes = [8, 128], strides = [1, 1]} : vector<8x512xf32> to vector<8x128xf32>
    %cst_16 = arith.constant 5.000000e-01 : f32
    %40 = vector.broadcast %cst_16 : f32 to vector<8x128xf32>
    %41 = arith.mulf %40, %39 : vector<8x128xf32>
    %42 = math.tanh %41 : vector<8x128xf32>
    %cst_17 = arith.constant 5.000000e-01 : f32
    %43 = vector.broadcast %cst_17 : f32 to vector<8x128xf32>
    %44 = arith.mulf %43, %42 : vector<8x128xf32>
    %cst_18 = arith.constant 5.000000e-01 : f32
    %45 = vector.broadcast %cst_18 : f32 to vector<8x128xf32>
    %46 = arith.addf %44, %45 : vector<8x128xf32>
    %47 = arith.mulf %36, %16 : vector<8x128xf32>
    %48 = arith.mulf %28, %38 : vector<8x128xf32>
    %49 = arith.addf %47, %48 : vector<8x128xf32>
    %50 = math.tanh %49 : vector<8x128xf32>
    %51 = arith.mulf %46, %50 : vector<8x128xf32>
    %52 = vector.extract_strided_slice %14 {offsets = [8, 0], sizes = [8, 512], strides = [1, 1]} : vector<64x512xf32> to vector<8x512xf32>
    %c0_19 = arith.constant 0 : index
    %c0_20 = arith.constant 0 : index
    %53 = vector.load %arg2[%c0_19, %c0_20] : memref<128x512xf32, #tpu.memory_space<vmem>>, vector<128x512xf32>
    %cst_21 = arith.constant dense<0.000000e+00> : vector<8x512xf32>
    %54 = tpu.matmul %51, %53, %cst_21 {dimension_numbers = #tpu.dot_dimension_numbers<[1], [0], [0], [1], [0, 0, 1, 1], [], []>} : vector<8x128xf32>, vector<128x512xf32>, vector<8x512xf32> -> vector<8x512xf32>
    %55 = arith.addf %52, %54 : vector<8x512xf32>
    %56 = vector.extract_strided_slice %55 {offsets = [0, 0], sizes = [8, 128], strides = [1, 1]} : vector<8x512xf32> to vector<8x128xf32>
    %cst_22 = arith.constant 5.000000e-01 : f32
    %57 = vector.broadcast %cst_22 : f32 to vector<8x128xf32>
    %58 = arith.mulf %57, %56 : vector<8x128xf32>
    %59 = math.tanh %58 : vector<8x128xf32>
    %cst_23 = arith.constant 5.000000e-01 : f32
    %60 = vector.broadcast %cst_23 : f32 to vector<8x128xf32>
    %61 = arith.mulf %60, %59 : vector<8x128xf32>
    %cst_24 = arith.constant 5.000000e-01 : f32
    %62 = vector.broadcast %cst_24 : f32 to vector<8x128xf32>
    %63 = arith.addf %61, %62 : vector<8x128xf32>
    %64 = vector.extract_strided_slice %55 {offsets = [0, 128], sizes = [8, 128], strides = [1, 1]} : vector<8x512xf32> to vector<8x128xf32>
    %cst_25 = arith.constant 5.000000e-01 : f32
    %65 = vector.broadcast %cst_25 : f32 to vector<8x128xf32>
    %66 = arith.mulf %65, %64 : vector<8x128xf32>
    %67 = math.tanh %66 : vector<8x128xf32>
    %cst_26 = arith.constant 5.000000e-01 : f32
    %68 = vector.broadcast %cst_26 : f32 to vector<8x128xf32>
    %69 = arith.mulf %68, %67 : vector<8x128xf32>
    %cst_27 = arith.constant 5.000000e-01 : f32
    %70 = vector.broadcast %cst_27 : f32 to vector<8x128xf32>
    %71 = arith.addf %69, %70 : vector<8x128xf32>
    %72 = vector.extract_strided_slice %55 {offsets = [0, 256], sizes = [8, 128], strides = [1, 1]} : vector<8x512xf32> to vector<8x128xf32>
    %73 = math.tanh %72 : vector<8x128xf32>
    %74 = vector.extract_strided_slice %55 {offsets = [0, 384], sizes = [8, 128], strides = [1, 1]} : vector<8x512xf32> to vector<8x128xf32>
    %cst_28 = arith.constant 5.000000e-01 : f32
    %75 = vector.broadcast %cst_28 : f32 to vector<8x128xf32>
    %76 = arith.mulf %75, %74 : vector<8x128xf32>
    %77 = math.tanh %76 : vector<8x128xf32>
    %cst_29 = arith.constant 5.000000e-01 : f32
    %78 = vector.broadcast %cst_29 : f32 to vector<8x128xf32>
    %79 = arith.mulf %78, %77 : vector<8x128xf32>
    %cst_30 = arith.constant 5.000000e-01 : f32
    %80 = vector.broadcast %cst_30 : f32 to vector<8x128xf32>
    %81 = arith.addf %79, %80 : vector<8x128xf32>
    %82 = arith.mulf %71, %49 : vector<8x128xf32>
    %83 = arith.mulf %63, %73 : vector<8x128xf32>
    %84 = arith.addf %82, %83 : vector<8x128xf32>
    %85 = math.tanh %84 : vector<8x128xf32>
    %86 = arith.mulf %81, %85 : vector<8x128xf32>
    %87 = vector.extract_strided_slice %14 {offsets = [16, 0], sizes = [8, 512], strides = [1, 1]} : vector<64x512xf32> to vector<8x512xf32>
    %c0_31 = arith.constant 0 : index
    %c0_32 = arith.constant 0 : index
    %88 = vector.load %arg2[%c0_31, %c0_32] : memref<128x512xf32, #tpu.memory_space<vmem>>, vector<128x512xf32>
    %cst_33 = arith.constant dense<0.000000e+00> : vector<8x512xf32>
    %89 = tpu.matmul %86, %88, %cst_33 {dimension_numbers = #tpu.dot_dimension_numbers<[1], [0], [0], [1], [0, 0, 1, 1], [], []>} : vector<8x128xf32>, vector<128x512xf32>, vector<8x512xf32> -> vector<8x512xf32>
    %90 = arith.addf %87, %89 : vector<8x512xf32>
    %91 = vector.extract_strided_slice %90 {offsets = [0, 0], sizes = [8, 128], strides = [1, 1]} : vector<8x512xf32> to vector<8x128xf32>
    %cst_34 = arith.constant 5.000000e-01 : f32
    %92 = vector.broadcast %cst_34 : f32 to vector<8x128xf32>
    %93 = arith.mulf %92, %91 : vector<8x128xf32>
    %94 = math.tanh %93 : vector<8x128xf32>
    %cst_35 = arith.constant 5.000000e-01 : f32
    %95 = vector.broadcast %cst_35 : f32 to vector<8x128xf32>
    %96 = arith.mulf %95, %94 : vector<8x128xf32>
    %cst_36 = arith.constant 5.000000e-01 : f32
    %97 = vector.broadcast %cst_36 : f32 to vector<8x128xf32>
    %98 = arith.addf %96, %97 : vector<8x128xf32>
    %99 = vector.extract_strided_slice %90 {offsets = [0, 128], sizes = [8, 128], strides = [1, 1]} : vector<8x512xf32> to vector<8x128xf32>
    %cst_37 = arith.constant 5.000000e-01 : f32
    %100 = vector.broadcast %cst_37 : f32 to vector<8x128xf32>
    %101 = arith.mulf %100, %99 : vector<8x128xf32>
    %102 = math.tanh %101 : vector<8x128xf32>
    %cst_38 = arith.constant 5.000000e-01 : f32
    %103 = vector.broadcast %cst_38 : f32 to vector<8x128xf32>
    %104 = arith.mulf %103, %102 : vector<8x128xf32>
    %cst_39 = arith.constant 5.000000e-01 : f32
    %105 = vector.broadcast %cst_39 : f32 to vector<8x128xf32>
    %106 = arith.addf %104, %105 : vector<8x128xf32>
    %107 = vector.extract_strided_slice %90 {offsets = [0, 256], sizes = [8, 128], strides = [1, 1]} : vector<8x512xf32> to vector<8x128xf32>
    %108 = math.tanh %107 : vector<8x128xf32>
    %109 = vector.extract_strided_slice %90 {offsets = [0, 384], sizes = [8, 128], strides = [1, 1]} : vector<8x512xf32> to vector<8x128xf32>
    %cst_40 = arith.constant 5.000000e-01 : f32
    %110 = vector.broadcast %cst_40 : f32 to vector<8x128xf32>
    %111 = arith.mulf %110, %109 : vector<8x128xf32>
    %112 = math.tanh %111 : vector<8x128xf32>
    %cst_41 = arith.constant 5.000000e-01 : f32
    %113 = vector.broadcast %cst_41 : f32 to vector<8x128xf32>
    %114 = arith.mulf %113, %112 : vector<8x128xf32>
    %cst_42 = arith.constant 5.000000e-01 : f32
    %115 = vector.broadcast %cst_42 : f32 to vector<8x128xf32>
    %116 = arith.addf %114, %115 : vector<8x128xf32>
    %117 = arith.mulf %106, %84 : vector<8x128xf32>
    %118 = arith.mulf %98, %108 : vector<8x128xf32>
    %119 = arith.addf %117, %118 : vector<8x128xf32>
    %120 = math.tanh %119 : vector<8x128xf32>
    %121 = arith.mulf %116, %120 : vector<8x128xf32>
    %122 = vector.extract_strided_slice %14 {offsets = [24, 0], sizes = [8, 512], strides = [1, 1]} : vector<64x512xf32> to vector<8x512xf32>
    %c0_43 = arith.constant 0 : index
    %c0_44 = arith.constant 0 : index
    %123 = vector.load %arg2[%c0_43, %c0_44] : memref<128x512xf32, #tpu.memory_space<vmem>>, vector<128x512xf32>
    %cst_45 = arith.constant dense<0.000000e+00> : vector<8x512xf32>
    %124 = tpu.matmul %121, %123, %cst_45 {dimension_numbers = #tpu.dot_dimension_numbers<[1], [0], [0], [1], [0, 0, 1, 1], [], []>} : vector<8x128xf32>, vector<128x512xf32>, vector<8x512xf32> -> vector<8x512xf32>
    %125 = arith.addf %122, %124 : vector<8x512xf32>
    %126 = vector.extract_strided_slice %125 {offsets = [0, 0], sizes = [8, 128], strides = [1, 1]} : vector<8x512xf32> to vector<8x128xf32>
    %cst_46 = arith.constant 5.000000e-01 : f32
    %127 = vector.broadcast %cst_46 : f32 to vector<8x128xf32>
    %128 = arith.mulf %127, %126 : vector<8x128xf32>
    %129 = math.tanh %128 : vector<8x128xf32>
    %cst_47 = arith.constant 5.000000e-01 : f32
    %130 = vector.broadcast %cst_47 : f32 to vector<8x128xf32>
    %131 = arith.mulf %130, %129 : vector<8x128xf32>
    %cst_48 = arith.constant 5.000000e-01 : f32
    %132 = vector.broadcast %cst_48 : f32 to vector<8x128xf32>
    %133 = arith.addf %131, %132 : vector<8x128xf32>
    %134 = vector.extract_strided_slice %125 {offsets = [0, 128], sizes = [8, 128], strides = [1, 1]} : vector<8x512xf32> to vector<8x128xf32>
    %cst_49 = arith.constant 5.000000e-01 : f32
    %135 = vector.broadcast %cst_49 : f32 to vector<8x128xf32>
    %136 = arith.mulf %135, %134 : vector<8x128xf32>
    %137 = math.tanh %136 : vector<8x128xf32>
    %cst_50 = arith.constant 5.000000e-01 : f32
    %138 = vector.broadcast %cst_50 : f32 to vector<8x128xf32>
    %139 = arith.mulf %138, %137 : vector<8x128xf32>
    %cst_51 = arith.constant 5.000000e-01 : f32
    %140 = vector.broadcast %cst_51 : f32 to vector<8x128xf32>
    %141 = arith.addf %139, %140 : vector<8x128xf32>
    %142 = vector.extract_strided_slice %125 {offsets = [0, 256], sizes = [8, 128], strides = [1, 1]} : vector<8x512xf32> to vector<8x128xf32>
    %143 = math.tanh %142 : vector<8x128xf32>
    %144 = vector.extract_strided_slice %125 {offsets = [0, 384], sizes = [8, 128], strides = [1, 1]} : vector<8x512xf32> to vector<8x128xf32>
    %cst_52 = arith.constant 5.000000e-01 : f32
    %145 = vector.broadcast %cst_52 : f32 to vector<8x128xf32>
    %146 = arith.mulf %145, %144 : vector<8x128xf32>
    %147 = math.tanh %146 : vector<8x128xf32>
    %cst_53 = arith.constant 5.000000e-01 : f32
    %148 = vector.broadcast %cst_53 : f32 to vector<8x128xf32>
    %149 = arith.mulf %148, %147 : vector<8x128xf32>
    %cst_54 = arith.constant 5.000000e-01 : f32
    %150 = vector.broadcast %cst_54 : f32 to vector<8x128xf32>
    %151 = arith.addf %149, %150 : vector<8x128xf32>
    %152 = arith.mulf %141, %119 : vector<8x128xf32>
    %153 = arith.mulf %133, %143 : vector<8x128xf32>
    %154 = arith.addf %152, %153 : vector<8x128xf32>
    %155 = math.tanh %154 : vector<8x128xf32>
    %156 = arith.mulf %151, %155 : vector<8x128xf32>
    %157 = vector.extract_strided_slice %14 {offsets = [32, 0], sizes = [8, 512], strides = [1, 1]} : vector<64x512xf32> to vector<8x512xf32>
    %c0_55 = arith.constant 0 : index
    %c0_56 = arith.constant 0 : index
    %158 = vector.load %arg2[%c0_55, %c0_56] : memref<128x512xf32, #tpu.memory_space<vmem>>, vector<128x512xf32>
    %cst_57 = arith.constant dense<0.000000e+00> : vector<8x512xf32>
    %159 = tpu.matmul %156, %158, %cst_57 {dimension_numbers = #tpu.dot_dimension_numbers<[1], [0], [0], [1], [0, 0, 1, 1], [], []>} : vector<8x128xf32>, vector<128x512xf32>, vector<8x512xf32> -> vector<8x512xf32>
    %160 = arith.addf %157, %159 : vector<8x512xf32>
    %161 = vector.extract_strided_slice %160 {offsets = [0, 0], sizes = [8, 128], strides = [1, 1]} : vector<8x512xf32> to vector<8x128xf32>
    %cst_58 = arith.constant 5.000000e-01 : f32
    %162 = vector.broadcast %cst_58 : f32 to vector<8x128xf32>
    %163 = arith.mulf %162, %161 : vector<8x128xf32>
    %164 = math.tanh %163 : vector<8x128xf32>
    %cst_59 = arith.constant 5.000000e-01 : f32
    %165 = vector.broadcast %cst_59 : f32 to vector<8x128xf32>
    %166 = arith.mulf %165, %164 : vector<8x128xf32>
    %cst_60 = arith.constant 5.000000e-01 : f32
    %167 = vector.broadcast %cst_60 : f32 to vector<8x128xf32>
    %168 = arith.addf %166, %167 : vector<8x128xf32>
    %169 = vector.extract_strided_slice %160 {offsets = [0, 128], sizes = [8, 128], strides = [1, 1]} : vector<8x512xf32> to vector<8x128xf32>
    %cst_61 = arith.constant 5.000000e-01 : f32
    %170 = vector.broadcast %cst_61 : f32 to vector<8x128xf32>
    %171 = arith.mulf %170, %169 : vector<8x128xf32>
    %172 = math.tanh %171 : vector<8x128xf32>
    %cst_62 = arith.constant 5.000000e-01 : f32
    %173 = vector.broadcast %cst_62 : f32 to vector<8x128xf32>
    %174 = arith.mulf %173, %172 : vector<8x128xf32>
    %cst_63 = arith.constant 5.000000e-01 : f32
    %175 = vector.broadcast %cst_63 : f32 to vector<8x128xf32>
    %176 = arith.addf %174, %175 : vector<8x128xf32>
    %177 = vector.extract_strided_slice %160 {offsets = [0, 256], sizes = [8, 128], strides = [1, 1]} : vector<8x512xf32> to vector<8x128xf32>
    %178 = math.tanh %177 : vector<8x128xf32>
    %179 = vector.extract_strided_slice %160 {offsets = [0, 384], sizes = [8, 128], strides = [1, 1]} : vector<8x512xf32> to vector<8x128xf32>
    %cst_64 = arith.constant 5.000000e-01 : f32
    %180 = vector.broadcast %cst_64 : f32 to vector<8x128xf32>
    %181 = arith.mulf %180, %179 : vector<8x128xf32>
    %182 = math.tanh %181 : vector<8x128xf32>
    %cst_65 = arith.constant 5.000000e-01 : f32
    %183 = vector.broadcast %cst_65 : f32 to vector<8x128xf32>
    %184 = arith.mulf %183, %182 : vector<8x128xf32>
    %cst_66 = arith.constant 5.000000e-01 : f32
    %185 = vector.broadcast %cst_66 : f32 to vector<8x128xf32>
    %186 = arith.addf %184, %185 : vector<8x128xf32>
    %187 = arith.mulf %176, %154 : vector<8x128xf32>
    %188 = arith.mulf %168, %178 : vector<8x128xf32>
    %189 = arith.addf %187, %188 : vector<8x128xf32>
    %190 = math.tanh %189 : vector<8x128xf32>
    %191 = arith.mulf %186, %190 : vector<8x128xf32>
    %192 = vector.extract_strided_slice %14 {offsets = [40, 0], sizes = [8, 512], strides = [1, 1]} : vector<64x512xf32> to vector<8x512xf32>
    %c0_67 = arith.constant 0 : index
    %c0_68 = arith.constant 0 : index
    %193 = vector.load %arg2[%c0_67, %c0_68] : memref<128x512xf32, #tpu.memory_space<vmem>>, vector<128x512xf32>
    %cst_69 = arith.constant dense<0.000000e+00> : vector<8x512xf32>
    %194 = tpu.matmul %191, %193, %cst_69 {dimension_numbers = #tpu.dot_dimension_numbers<[1], [0], [0], [1], [0, 0, 1, 1], [], []>} : vector<8x128xf32>, vector<128x512xf32>, vector<8x512xf32> -> vector<8x512xf32>
    %195 = arith.addf %192, %194 : vector<8x512xf32>
    %196 = vector.extract_strided_slice %195 {offsets = [0, 0], sizes = [8, 128], strides = [1, 1]} : vector<8x512xf32> to vector<8x128xf32>
    %cst_70 = arith.constant 5.000000e-01 : f32
    %197 = vector.broadcast %cst_70 : f32 to vector<8x128xf32>
    %198 = arith.mulf %197, %196 : vector<8x128xf32>
    %199 = math.tanh %198 : vector<8x128xf32>
    %cst_71 = arith.constant 5.000000e-01 : f32
    %200 = vector.broadcast %cst_71 : f32 to vector<8x128xf32>
    %201 = arith.mulf %200, %199 : vector<8x128xf32>
    %cst_72 = arith.constant 5.000000e-01 : f32
    %202 = vector.broadcast %cst_72 : f32 to vector<8x128xf32>
    %203 = arith.addf %201, %202 : vector<8x128xf32>
    %204 = vector.extract_strided_slice %195 {offsets = [0, 128], sizes = [8, 128], strides = [1, 1]} : vector<8x512xf32> to vector<8x128xf32>
    %cst_73 = arith.constant 5.000000e-01 : f32
    %205 = vector.broadcast %cst_73 : f32 to vector<8x128xf32>
    %206 = arith.mulf %205, %204 : vector<8x128xf32>
    %207 = math.tanh %206 : vector<8x128xf32>
    %cst_74 = arith.constant 5.000000e-01 : f32
    %208 = vector.broadcast %cst_74 : f32 to vector<8x128xf32>
    %209 = arith.mulf %208, %207 : vector<8x128xf32>
    %cst_75 = arith.constant 5.000000e-01 : f32
    %210 = vector.broadcast %cst_75 : f32 to vector<8x128xf32>
    %211 = arith.addf %209, %210 : vector<8x128xf32>
    %212 = vector.extract_strided_slice %195 {offsets = [0, 256], sizes = [8, 128], strides = [1, 1]} : vector<8x512xf32> to vector<8x128xf32>
    %213 = math.tanh %212 : vector<8x128xf32>
    %214 = vector.extract_strided_slice %195 {offsets = [0, 384], sizes = [8, 128], strides = [1, 1]} : vector<8x512xf32> to vector<8x128xf32>
    %cst_76 = arith.constant 5.000000e-01 : f32
    %215 = vector.broadcast %cst_76 : f32 to vector<8x128xf32>
    %216 = arith.mulf %215, %214 : vector<8x128xf32>
    %217 = math.tanh %216 : vector<8x128xf32>
    %cst_77 = arith.constant 5.000000e-01 : f32
    %218 = vector.broadcast %cst_77 : f32 to vector<8x128xf32>
    %219 = arith.mulf %218, %217 : vector<8x128xf32>
    %cst_78 = arith.constant 5.000000e-01 : f32
    %220 = vector.broadcast %cst_78 : f32 to vector<8x128xf32>
    %221 = arith.addf %219, %220 : vector<8x128xf32>
    %222 = arith.mulf %211, %189 : vector<8x128xf32>
    %223 = arith.mulf %203, %213 : vector<8x128xf32>
    %224 = arith.addf %222, %223 : vector<8x128xf32>
    %225 = math.tanh %224 : vector<8x128xf32>
    %226 = arith.mulf %221, %225 : vector<8x128xf32>
    %227 = vector.extract_strided_slice %14 {offsets = [48, 0], sizes = [8, 512], strides = [1, 1]} : vector<64x512xf32> to vector<8x512xf32>
    %c0_79 = arith.constant 0 : index
    %c0_80 = arith.constant 0 : index
    %228 = vector.load %arg2[%c0_79, %c0_80] : memref<128x512xf32, #tpu.memory_space<vmem>>, vector<128x512xf32>
    %cst_81 = arith.constant dense<0.000000e+00> : vector<8x512xf32>
    %229 = tpu.matmul %226, %228, %cst_81 {dimension_numbers = #tpu.dot_dimension_numbers<[1], [0], [0], [1], [0, 0, 1, 1], [], []>} : vector<8x128xf32>, vector<128x512xf32>, vector<8x512xf32> -> vector<8x512xf32>
    %230 = arith.addf %227, %229 : vector<8x512xf32>
    %231 = vector.extract_strided_slice %230 {offsets = [0, 0], sizes = [8, 128], strides = [1, 1]} : vector<8x512xf32> to vector<8x128xf32>
    %cst_82 = arith.constant 5.000000e-01 : f32
    %232 = vector.broadcast %cst_82 : f32 to vector<8x128xf32>
    %233 = arith.mulf %232, %231 : vector<8x128xf32>
    %234 = math.tanh %233 : vector<8x128xf32>
    %cst_83 = arith.constant 5.000000e-01 : f32
    %235 = vector.broadcast %cst_83 : f32 to vector<8x128xf32>
    %236 = arith.mulf %235, %234 : vector<8x128xf32>
    %cst_84 = arith.constant 5.000000e-01 : f32
    %237 = vector.broadcast %cst_84 : f32 to vector<8x128xf32>
    %238 = arith.addf %236, %237 : vector<8x128xf32>
    %239 = vector.extract_strided_slice %230 {offsets = [0, 128], sizes = [8, 128], strides = [1, 1]} : vector<8x512xf32> to vector<8x128xf32>
    %cst_85 = arith.constant 5.000000e-01 : f32
    %240 = vector.broadcast %cst_85 : f32 to vector<8x128xf32>
    %241 = arith.mulf %240, %239 : vector<8x128xf32>
    %242 = math.tanh %241 : vector<8x128xf32>
    %cst_86 = arith.constant 5.000000e-01 : f32
    %243 = vector.broadcast %cst_86 : f32 to vector<8x128xf32>
    %244 = arith.mulf %243, %242 : vector<8x128xf32>
    %cst_87 = arith.constant 5.000000e-01 : f32
    %245 = vector.broadcast %cst_87 : f32 to vector<8x128xf32>
    %246 = arith.addf %244, %245 : vector<8x128xf32>
    %247 = vector.extract_strided_slice %230 {offsets = [0, 256], sizes = [8, 128], strides = [1, 1]} : vector<8x512xf32> to vector<8x128xf32>
    %248 = math.tanh %247 : vector<8x128xf32>
    %249 = vector.extract_strided_slice %230 {offsets = [0, 384], sizes = [8, 128], strides = [1, 1]} : vector<8x512xf32> to vector<8x128xf32>
    %cst_88 = arith.constant 5.000000e-01 : f32
    %250 = vector.broadcast %cst_88 : f32 to vector<8x128xf32>
    %251 = arith.mulf %250, %249 : vector<8x128xf32>
    %252 = math.tanh %251 : vector<8x128xf32>
    %cst_89 = arith.constant 5.000000e-01 : f32
    %253 = vector.broadcast %cst_89 : f32 to vector<8x128xf32>
    %254 = arith.mulf %253, %252 : vector<8x128xf32>
    %cst_90 = arith.constant 5.000000e-01 : f32
    %255 = vector.broadcast %cst_90 : f32 to vector<8x128xf32>
    %256 = arith.addf %254, %255 : vector<8x128xf32>
    %257 = arith.mulf %246, %224 : vector<8x128xf32>
    %258 = arith.mulf %238, %248 : vector<8x128xf32>
    %259 = arith.addf %257, %258 : vector<8x128xf32>
    %260 = math.tanh %259 : vector<8x128xf32>
    %261 = arith.mulf %256, %260 : vector<8x128xf32>
    %262 = vector.extract_strided_slice %14 {offsets = [56, 0], sizes = [8, 512], strides = [1, 1]} : vector<64x512xf32> to vector<8x512xf32>
    %c0_91 = arith.constant 0 : index
    %c0_92 = arith.constant 0 : index
    %263 = vector.load %arg2[%c0_91, %c0_92] : memref<128x512xf32, #tpu.memory_space<vmem>>, vector<128x512xf32>
    %cst_93 = arith.constant dense<0.000000e+00> : vector<8x512xf32>
    %264 = tpu.matmul %261, %263, %cst_93 {dimension_numbers = #tpu.dot_dimension_numbers<[1], [0], [0], [1], [0, 0, 1, 1], [], []>} : vector<8x128xf32>, vector<128x512xf32>, vector<8x512xf32> -> vector<8x512xf32>
    %265 = arith.addf %262, %264 : vector<8x512xf32>
    %266 = vector.extract_strided_slice %265 {offsets = [0, 0], sizes = [8, 128], strides = [1, 1]} : vector<8x512xf32> to vector<8x128xf32>
    %cst_94 = arith.constant 5.000000e-01 : f32
    %267 = vector.broadcast %cst_94 : f32 to vector<8x128xf32>
    %268 = arith.mulf %267, %266 : vector<8x128xf32>
    %269 = math.tanh %268 : vector<8x128xf32>
    %cst_95 = arith.constant 5.000000e-01 : f32
    %270 = vector.broadcast %cst_95 : f32 to vector<8x128xf32>
    %271 = arith.mulf %270, %269 : vector<8x128xf32>
    %cst_96 = arith.constant 5.000000e-01 : f32
    %272 = vector.broadcast %cst_96 : f32 to vector<8x128xf32>
    %273 = arith.addf %271, %272 : vector<8x128xf32>
    %274 = vector.extract_strided_slice %265 {offsets = [0, 128], sizes = [8, 128], strides = [1, 1]} : vector<8x512xf32> to vector<8x128xf32>
    %cst_97 = arith.constant 5.000000e-01 : f32
    %275 = vector.broadcast %cst_97 : f32 to vector<8x128xf32>
    %276 = arith.mulf %275, %274 : vector<8x128xf32>
    %277 = math.tanh %276 : vector<8x128xf32>
    %cst_98 = arith.constant 5.000000e-01 : f32
    %278 = vector.broadcast %cst_98 : f32 to vector<8x128xf32>
    %279 = arith.mulf %278, %277 : vector<8x128xf32>
    %cst_99 = arith.constant 5.000000e-01 : f32
    %280 = vector.broadcast %cst_99 : f32 to vector<8x128xf32>
    %281 = arith.addf %279, %280 : vector<8x128xf32>
    %282 = vector.extract_strided_slice %265 {offsets = [0, 256], sizes = [8, 128], strides = [1, 1]} : vector<8x512xf32> to vector<8x128xf32>
    %283 = math.tanh %282 : vector<8x128xf32>
    %284 = vector.extract_strided_slice %265 {offsets = [0, 384], sizes = [8, 128], strides = [1, 1]} : vector<8x512xf32> to vector<8x128xf32>
    %cst_100 = arith.constant 5.000000e-01 : f32
    %285 = vector.broadcast %cst_100 : f32 to vector<8x128xf32>
    %286 = arith.mulf %285, %284 : vector<8x128xf32>
    %287 = math.tanh %286 : vector<8x128xf32>
    %cst_101 = arith.constant 5.000000e-01 : f32
    %288 = vector.broadcast %cst_101 : f32 to vector<8x128xf32>
    %289 = arith.mulf %288, %287 : vector<8x128xf32>
    %cst_102 = arith.constant 5.000000e-01 : f32
    %290 = vector.broadcast %cst_102 : f32 to vector<8x128xf32>
    %291 = arith.addf %289, %290 : vector<8x128xf32>
    %292 = arith.mulf %281, %259 : vector<8x128xf32>
    %293 = arith.mulf %273, %283 : vector<8x128xf32>
    %294 = arith.addf %292, %293 : vector<8x128xf32>
    %295 = math.tanh %294 : vector<8x128xf32>
    %296 = arith.mulf %291, %295 : vector<8x128xf32>
    %c0_103 = arith.constant 0 : index
    %c0_104 = arith.constant 0 : index
    %297 = vector.load %arg4[%c0_103, %c0_104] : memref<128x128xf32, #tpu.memory_space<vmem>>, vector<128x128xf32>
    %cst_105 = arith.constant dense<0.000000e+00> : vector<8x128xf32>
    %298 = tpu.matmul %296, %297, %cst_105 {dimension_numbers = #tpu.dot_dimension_numbers<[1], [0], [0], [1], [0, 0, 1, 1], [], []>} : vector<8x128xf32>, vector<128x128xf32>, vector<8x128xf32> -> vector<8x128xf32>
    %c0_106 = arith.constant 0 : index
    %c0_107 = arith.constant 0 : index
    %299 = vector.load %arg5[%c0_106, %c0_107] : memref<1x128xf32, #tpu.memory_space<vmem>>, vector<1x128xf32>
    %300 = vector.broadcast %299 : vector<1x128xf32> to vector<8x128xf32>
    %301 = arith.addf %298, %300 : vector<8x128xf32>
    %c0_108 = arith.constant 0 : index
    %c0_109 = arith.constant 0 : index
    %302 = vector.load %arg6[%c0_108, %c0_109] : memref<8x128xf32, #tpu.memory_space<vmem>>, vector<8x128xf32>
    tpu.vector_store %arg6[%c0_108, %c0_109], %301 {strides = array<i32>} : memref<8x128xf32, #tpu.memory_space<vmem>>, vector<8x128xf32>,
    return
  }
}

</mosaic_0001>

<bundles_post_ra>
// kernel: soc_predictor_forward.1
= control target key start
LH: loop header
LB: loop body
LE: loop exit
PB: predicated region body
PF: predicated region fallthrough
CT: control target
= control target key end

     0   :  { %11 = vsyncpa [#allocation3], 0  ;;  %s3255_s0 = inlined_call_operand.vmem [shape: f32[64,2], index: 0, kind: input, shape index: {}]   ;;  %s3256_s1 = inlined_call_operand.vmem [shape: f32[2,512], index: 1, kind: input, shape index: {}]   ;;  %s3257_s2 = inlined_call_operand.hbm [shape: f32[128,512], index: 2, kind: input, shape index: {}]   ;;  %s3258_s3 = inlined_call_operand.vmem [shape: f32[1,512], index: 3, kind: input, shape index: {}]   ;;  %s3259_s4 = inlined_call_operand.hbm [shape: f32[128,128], index: 4, kind: input, shape index: {}]   ;;  %s3260_s5 = inlined_call_operand.vmem [shape: f32[1,128], index: 5, kind: input, shape index: {}]   ;;  %s3261_s6 = inlined_call_operand.vmem [shape: f32[8,128], index: 6, kind: output, shape index: {}]  }
   0x1   :  { %12 = vsyncpa [#allocation5], 0  ;;  %s2536_s21 = smov [#allocation2]   ;;  %s2488_s25 = scalar_lea.hbm %s3257_s2, 8192 }
   0x2   :  { %s22_s22 = sshll.u32 %s2536_s21, 4  ;;  %p2489_p0 = scmp.ne.s32.totalorder %s3257_s2, %s2488_s25  ;;  %s23_s22 = int_to_ptr.vmem [resolvable:$true] %s22_s22 }
   0x3   :  { %p2492_p1 = scmp.lt.u32.totalorder %s2488_s25, %s3257_s2 }
   0x5   :  { %p2494_p2 = pnand %p2492_p1, %p2489_p0 }
   0x7   :  { %2497 = shalt.err (!%p2494_p2)
}
   0x8   :  { %s2498_s30 = scalar_lea.vmem %s23_s22, 8192  ;;  %p2503_p4 = scmp.lt.s32.totalorder %s23_s22, %s23_s22 }
   0x9   :  { %p2499_p3 = scmp.ne.s32.totalorder %s23_s22, %s2498_s30  ;;  %p2504_p5 = scmp.lt.s32.totalorder %s2498_s30, %s2498_s30 }
   0xb   :  { %p2505_p6 = por %p2504_p5, %p2503_p4 }
   0xd   :  { %p2506_p7 = pnand %p2505_p6, %p2499_p3 }
   0xf   :  { %2509 = shalt.err (!%p2506_p7)
}
  0x10   :  { %s2537_s7 = smov 512   ;;  %s2538_s8 = smov 32  }
  0x11   :  { %28 = dma.hbm_to_vmem [thread:$0]  %s3257_s2, 8192, %s23_s22, [#allocation3], %s2537_s7, %s2537_s7, %s2538_s8  }
  0x12   :  { %s2539_s11 = smov [#allocation4]   ;;  %s2510_s15 = scalar_lea.hbm %s3259_s4, 2048 }
  0x13   :  { %s36_s12 = sshll.u32 %s2539_s11, 4  ;;  %p2511_p8 = scmp.ne.s32.totalorder %s3259_s4, %s2510_s15  ;;  %s37_s12 = int_to_ptr.vmem [resolvable:$true] %s36_s12 }
  0x14   :  { %p2514_p9 = scmp.lt.u32.totalorder %s2510_s15, %s3259_s4 }
  0x16   :  { %p2516_p10 = pnand %p2514_p9, %p2511_p8 }
  0x18   :  { %2519 = shalt.err (!%p2516_p10)
}
  0x19   :  { %s2520_s20 = scalar_lea.vmem %s37_s12, 2048  ;;  %p2525_p12 = scmp.lt.s32.totalorder %s37_s12, %s37_s12 }
  0x1a   :  { %p2521_p11 = scmp.ne.s32.totalorder %s37_s12, %s2520_s20  ;;  %p2526_p13 = scmp.lt.s32.totalorder %s2520_s20, %s2520_s20 }
  0x1c   :  { %p2527_p0 = por %p2526_p13, %p2525_p12 }
  0x1e   :  { %p2528_p1 = pnand %p2527_p0, %p2521_p11 }
  0x20   :  { %2531 = shalt.err (!%p2528_p1)
}
  0x21   :  { %s2540_s2 = smov 128   ;;  %s2541_s21 = smov 8  }
  0x22   :  { %42 = dma.hbm_to_vmem [thread:$0]  %s3259_s4, 2048, %s37_s12, [#allocation5], %s2540_s2, %s2540_s2, %s2541_s21  }
  0x23   :  { %2532 = dma.done.wait [#allocation3], 8192  }
  0x24   :  { %2533 = vsyncadd [#allocation3], 4294959104 }
  0x25   :  { %2534 = dma.done.wait [#allocation5], 2048  }
  0x26   :  { %2535 = vsyncadd [#allocation5], 4294965248  ;;  %v3262_v0 = vmov 0.0   ;;  %v2543_v1 = vmov 0   ;;  %v327_v2 = vld [vmem:[#allocation2 + $0x8] sm:$0xff]  ;;  %v329_v4 = vld [vmem:[#allocation2 + $0x18] sm:$0xff] }
  0x27   :  { %454 = vmatprep.mubr.f32.mxu0 %v3262_v0  ;;  %525 = vmatprep.mubr.f32.mxu1 %v3262_v0  ;;  %v331_v3 = vld [vmem:[#allocation2 + $0x28] sm:$0xff]  ;;  %v333_v6 = vld [vmem:[#allocation2 + $0x38] sm:$0xff]  ;;  %v326_v7 = vld [vmem:[#allocation2] sm:$0xff]  ;;  %vm2546_vm0 = vmmov 0  }
  0x28   :  { %2405 = vset.pattern.permute.xlu1 %v2543_v1  ;;  %2403 = vset.pattern.permute.xlu0 %v2543_v1  ;;  %v2610_v5 = vpack.c.bf16 %v331_v3, %v327_v2  ;;  %v330_v8 = vld [vmem:[#allocation2 + $0x20] sm:$0xff]  ;;  %v2612_v9 = vpack.c.bf16 %v333_v6, %v329_v4  ;;  %v328_v11 = vld [vmem:[#allocation2 + $0x10] sm:$0xff]  ;;  %v335_v13 = vld [vmem:[#allocation2 + $0x48] sm:$0xff] }
  0x29   :  { %v2614_v10 = vpack.c.bf16 %v330_v8, %v326_v7  ;;  %v332_v12 = vld [vmem:[#allocation2 + $0x30] sm:$0xff]  ;;  %v339_v15 = vld [vmem:[#allocation2 + $0x68] sm:$0xff]  ;;  %v337_v16 = vld [vmem:[#allocation2 + $0x58] sm:$0xff] }
  0x2a   :  { %3274 = vst [vmem:[#allocation8_spill] sm:$0xff] %v2610_v5  ;;  %3275 = vst [vmem:[#allocation9_spill] sm:$0xff] %v2612_v9  ;;  %1857 = vmatprep.subr.bf16.mxu0 %v2610_v5  ;;  %v2617_v14 = vpack.c.bf16 %v332_v12, %v328_v11  ;;  %v341_v17 = vld [vmem:[#allocation2 + $0x78] sm:$0xff]  ;;  %1889 = vmatprep.subr.bf16.mxu1 %v2612_v9  ;;  %v2621_v18 = vpack.c.bf16 %v339_v15, %v335_v13  ;;  %v334_v20 = vld [vmem:[#allocation2 + $0x40] sm:$0xff] }
  0x2b   :  { %1859 = vmatpush1.bf16.msra.mxu0 %v2614_v10  ;;  %v2623_v19 = vpack.c.bf16 %v341_v17, %v337_v16  ;;  %v338_v21 = vld [vmem:[#allocation2 + $0x60] sm:$0xff]  ;;  %v336_v22 = vld [vmem:[#allocation2 + $0x50] sm:$0xff]  ;;  %v343_v25 = vld [vmem:[#allocation2 + $0x88] sm:$0xff] }
  0x2c   :  { %1891 = vmatpush1.bf16.msra.mxu1 %v2617_v14  ;;  %v2626_v23 = vpack.c.bf16 %v338_v21, %v334_v20  ;;  %v340_v24 = vld [vmem:[#allocation2 + $0x70] sm:$0xff]  ;;  %v347_v26 = vld [vmem:[#allocation2 + $0xa8] sm:$0xff]  ;;  %1861 = vmatprep.subr.bf16.mxu0 %v2621_v18  ;;  %v345_v29 = vld [vmem:[#allocation2 + $0x98] sm:$0xff] }
  0x2d   :  { %1893 = vmatprep.subr.bf16.mxu1 %v2623_v19  ;;  %v2630_v27 = vpack.c.bf16 %v340_v24, %v336_v22  ;;  %v2632_v28 = vpack.c.bf16 %v347_v26, %v343_v25  ;;  %v349_v30 = vld [vmem:[#allocation2 + $0xb8] sm:$0xff]  ;;  %v342_v31 = vld [vmem:[#allocation2 + $0x80] sm:$0xff]  ;;  %v344_v34 = vld [vmem:[#allocation2 + $0x90] sm:$0xff] }
  0x2e   :  { %v2634_v32 = vpack.c.bf16 %v349_v30, %v345_v29  ;;  %v346_v33 = vld [vmem:[#allocation2 + $0xa0] sm:$0xff]  ;;  %v348_v35 = vld [vmem:[#allocation2 + $0xb0] sm:$0xff]  ;;  %v351_v37 = vld [vmem:[#allocation2 + $0xc8] sm:$0xff] }
  0x2f   :  { %1863 = vmatpush1.bf16.msra.mxu0 %v2626_v23  ;;  %v2637_v36 = vpack.c.bf16 %v346_v33, %v342_v31  ;;  %v355_v38 = vld [vmem:[#allocation2 + $0xe8] sm:$0xff]  ;;  %v353_v39 = vld [vmem:[#allocation2 + $0xd8] sm:$0xff]  ;;  %v2641_v40 = vpack.c.bf16 %v348_v35, %v344_v34  ;;  %v350_v43 = vld [vmem:[#allocation2 + $0xc0] sm:$0xff] }
  0x30   :  { %1895 = vmatpush1.bf16.msra.mxu1 %v2630_v27  ;;  %1865 = vmatprep.subr.bf16.mxu0 %v2632_v28  ;;  %v2643_v41 = vpack.c.bf16 %v355_v38, %v351_v37  ;;  %v357_v42 = vld [vmem:[#allocation2 + $0xf8] sm:$0xff]  ;;  %v354_v44 = vld [vmem:[#allocation2 + $0xe0] sm:$0xff]  ;;  %v352_v46 = vld [vmem:[#allocation2 + $0xd0] sm:$0xff] }
  0x31   :  { %1897 = vmatprep.subr.bf16.mxu1 %v2634_v32  ;;  %v2646_v45 = vpack.c.bf16 %v357_v42, %v353_v39  ;;  %v356_v47 = vld [vmem:[#allocation2 + $0xf0] sm:$0xff]  ;;  %v359_v48 = vld [vmem:[#allocation2 + $0x108] sm:$0xff]  ;;  %v361_v50 = vld [vmem:[#allocation2 + $0x118] sm:$0xff]  ;;  %v2649_v52 = vpack.c.bf16 %v354_v44, %v350_v43 }
  0x32   :  { %v363_v49 = vld [vmem:[#allocation2 + $0x128] sm:$0xff]  ;;  %v365_v51 = vld [vmem:[#allocation2 + $0x138] sm:$0xff]  ;;  %v2653_v53 = vpack.c.bf16 %v356_v47, %v352_v46  ;;  %v358_v55 = vld [vmem:[#allocation2 + $0x100] sm:$0xff] }
  0x33   :  { %1867 = vmatpush1.bf16.msra.mxu0 %v2637_v36  ;;  %v2655_v54 = vpack.c.bf16 %v363_v49, %v359_v48  ;;  %v362_v56 = vld [vmem:[#allocation2 + $0x120] sm:$0xff]  ;;  %v360_v57 = vld [vmem:[#allocation2 + $0x110] sm:$0xff]  ;;  %v2658_v58 = vpack.c.bf16 %v365_v51, %v361_v50  ;;  %v367_v60 = vld [vmem:[#allocation2 + $0x148] sm:$0xff]  ;;  %v2544_v50 = vmov 1  }
  0x34   :  { %1899 = vmatpush1.bf16.msra.mxu1 %v2641_v40  ;;  %1869 = vmatprep.subr.bf16.mxu0 %v2643_v41  ;;  %v364_v59 = vld [vmem:[#allocation2 + $0x130] sm:$0xff]  ;;  %v371_v61 = vld [vmem:[#allocation2 + $0x168] sm:$0xff]  ;;  %v369_v62 = vld [vmem:[#allocation2 + $0x158] sm:$0xff]  ;;  %v2661_v2 = vpack.c.bf16 %v362_v56, %v358_v55 }
  0x35   :  { %1901 = vmatprep.subr.bf16.mxu1 %v2646_v45  ;;  %v373_v63 = vld [vmem:[#allocation2 + $0x178] sm:$0xff]  ;;  %v2665_v3 = vpack.c.bf16 %v364_v59, %v360_v57  ;;  %v2667_v4 = vpack.c.bf16 %v371_v61, %v367_v60  ;;  %v366_v6 = vld [vmem:[#allocation2 + $0x140] sm:$0xff]  ;;  %v368_v8 = vld [vmem:[#allocation2 + $0x150] sm:$0xff] }
  0x36   :  { %v370_v7 = vld [vmem:[#allocation2 + $0x160] sm:$0xff]  ;;  %v2670_v11 = vpack.c.bf16 %v373_v63, %v369_v62  ;;  %v372_v12 = vld [vmem:[#allocation2 + $0x170] sm:$0xff]  ;;  %v375_v13 = vld [vmem:[#allocation2 + $0x188] sm:$0xff]  ;;  %v101_v62 = vlaneseq }
  0x37   :  { %1871 = vmatpush1.bf16.msra.mxu0 %v2649_v52  ;;  %v379_v15 = vld [vmem:[#allocation2 + $0x1a8] sm:$0xff]  ;;  %v377_v16 = vld [vmem:[#allocation2 + $0x198] sm:$0xff]  ;;  %v2673_v20 = vpack.c.bf16 %v370_v7, %v366_v6  ;;  %v374_v21 = vld [vmem:[#allocation2 + $0x180] sm:$0xff]  ;;  %v2677_v24 = vpack.c.bf16 %v372_v12, %v368_v8 }
  0x38   :  { %1903 = vmatpush1.bf16.msra.mxu1 %v2653_v53  ;;  %1873 = vmatprep.subr.bf16.mxu0 %v2655_v54  ;;  %v381_v17 = vld [vmem:[#allocation2 + $0x1b8] sm:$0xff]  ;;  %v378_v22 = vld [vmem:[#allocation2 + $0x1a0] sm:$0xff]  ;;  %v2679_v25 = vpack.c.bf16 %v379_v15, %v375_v13  ;;  %v376_v26 = vld [vmem:[#allocation2 + $0x190] sm:$0xff]  ;;  %v102_v63 = vshrl.u32 %v101_v62, 7 }
  0x39   :  { %1905 = vmatprep.subr.bf16.mxu1 %v2658_v58  ;;  %v52_v29 = vld [vmem:[%s3255_s0 + $0x8] sm:$0xff]  ;;  %v51_v30 = vld [vmem:[%s3255_s0] sm:$0xff]  ;;  %v2688_v31 = vpack.c.bf16 %v381_v17, %v377_v16  ;;  %v380_v33 = vld [vmem:[#allocation2 + $0x1b0] sm:$0xff]  ;;  %v2691_v39 = vpack.c.bf16 %v378_v22, %v374_v21 }
  0x3a   :  { %v383_v34 = vld [vmem:[#allocation2 + $0x1c8] sm:$0xff]  ;;  %67 = vperm.xlu1 %2405, %v52_v29   ;;  %v385_v37 = vld [vmem:[#allocation2 + $0x1d8] sm:$0xff]  ;;  %62 = vperm.xlu0 %2403, %v51_v30   ;;  %v2695_v42 = vpack.c.bf16 %v380_v33, %v376_v26  ;;  %v382_v44 = vld [vmem:[#allocation2 + $0x1c0] sm:$0xff]  ;;  %v103_v6 = vsub.s32 0, %v102_v63  ;;  %v2785_v21 = vsub.s32 1, %v102_v63  ;;  %v2787_v22 = vsub.s32 2, %v102_v63 }
  0x3b   :  { %1875 = vmatpush1.bf16.msra.mxu0 %v2661_v2  ;;  %v387_v35 = vld [vmem:[#allocation2 + $0x1e8] sm:$0xff]  ;;  %v389_v38 = vld [vmem:[#allocation2 + $0x1f8] sm:$0xff]  ;;  %v386_v46 = vld [vmem:[#allocation2 + $0x1e0] sm:$0xff]  ;;  %v2789_v26 = vsub.s32 3, %v102_v63 }
  0x3c   :  { %1907 = vmatpush1.bf16.msra.mxu1 %v2665_v3  ;;  %1877 = vmatprep.subr.bf16.mxu0 %v2667_v4  ;;  %v2697_v43 = vpack.c.bf16 %v387_v35, %v383_v34  ;;  %v2700_v47 = vpack.c.bf16 %v389_v38, %v385_v37  ;;  %v384_v48 = vld [vmem:[#allocation2 + $0x1d0] sm:$0xff]  ;;  %v2703_v51 = vpack.c.bf16 %v386_v46, %v382_v44  ;;  %v54_v57 = vld [vmem:[%s3255_s0 + $0x18] sm:$0xff]  ;;  %v56_v59 = vld [vmem:[%s3255_s0 + $0x28] sm:$0xff] }
  0x3d   :  { %1909 = vmatprep.subr.bf16.mxu1 %v2670_v11  ;;  %v388_v49 = vld [vmem:[#allocation2 + $0x1f0] sm:$0xff]  ;;  %v58_v61 = vld [vmem:[%s3255_s0 + $0x38] sm:$0xff]  ;;  %v59_v7 = vld [vmem:[%s3256_s1] ss:$2 sm:$0xf] }
  0x3e   :  { %2406 = vset.pattern.permute.xlu1 %v2544_v50  ;;  %2404 = vset.pattern.permute.xlu0 %v2544_v50  ;;  %v2707_v55 = vpack.c.bf16 %v388_v49, %v384_v48  ;;  %v53_v56 = vld [vmem:[%s3255_s0 + $0x10] sm:$0xff]  ;;  %v1802_v13 = vld [vmem:[%s3256_s1 + $0x1] ss:$2 sm:$0xf]  ;;  %v2779_v15 = vrot.slane %v59_v7, %v103_v6  ;;  %v2806_v38 = vrot.slane %v59_v7, %v2785_v21 }
  0x3f   :  { %1879 = vmatpush1.bf16.msra.mxu0 %v2673_v20  ;;  %160 = vperm.xlu1 %2406, %v52_v29   ;;  %v57_v60 = vld [vmem:[%s3255_s0 + $0x30] sm:$0xff]  ;;  %v2783_v17 = vrot.slane %v1802_v13, %v103_v6  ;;  %v2809_v44 = vrot.slane %v59_v7, %v2787_v22  ;;  %v2812_v46 = vrot.slane %v59_v7, %v2789_v26 }
  0x40   :  { %1911 = vmatpush1.bf16.msra.mxu1 %v2677_v24  ;;  %1881 = vmatprep.subr.bf16.mxu0 %v2679_v25  ;;  %3276 = vst [vmem:[#allocation10_spill] sm:$0xff] %v2707_v55  ;;  %v2815_v48 = vrot.slane %v1802_v13, %v2785_v21  ;;  %v2818_v49 = vrot.slane %v1802_v13, %v2787_v22 }
  0x41   :  { %1913 = vmatprep.subr.bf16.mxu1 %v2688_v31  ;;  %156 = vperm.xlu0 %2404, %v51_v30   ;;  %v2796_v30 = vld [vmem:[%s3258_s3] sm:$0xf]  ;;  %v2821_v50 = vrot.slane %v1802_v13, %v2789_v26 }
  0x42   :  { %v2803_v35 = vrot.slane %v2796_v30, %v103_v6 }
  0x43   :  { %1883 = vmatpush1.bf16.msra.mxu0 %v2691_v39  ;;  %2407 = vset.pattern.permute.xlu1 %v2543_v1  ;;  %v55_v1 = vld [vmem:[%s3255_s0 + $0x20] sm:$0xff] }
  0x44   :  { %1915 = vmatpush1.bf16.msra.mxu1 %v2695_v42  ;;  %1885 = vmatprep.subr.bf16.mxu0 %v2697_v43 }
  0x45   :  { %1917 = vmatprep.subr.bf16.mxu1 %v2700_v47  ;;  %72 = vperm.xlu1 %2407, %v53_v56  }
  0x46   :  { %164 = vperm.xlu0 %2404, %v53_v56  }
  0x47   :  { %1887 = vmatpush1.bf16.msra.mxu0 %v2703_v51 }
  0x48   :  { %1919 = vmatpush1.bf16.msra.mxu1 %v2707_v55  ;;  %1921 = vmatprep.subr.bf16.mxu0 %v2610_v5 }
  0x49   :  { %1953 = vmatprep.subr.bf16.mxu1 %v2612_v9  ;;  %77 = vperm.xlu1 %2407, %v54_v57  }
  0x4a   :  { %455 = vmatmul.mubr.f32.vlgmr.msra.gmra.mrb[0].mxu0 %v3262_v0  ;;  %168 = vperm.xlu0 %2404, %v54_v57  }
  0x4b   :  { %526 = vmatmul.mubr.f32.vlgmr.msra.gmra.mrb[0].mxu1 %v3262_v0  ;;  %1923 = vmatpush1.bf16.msra.mxu0 %v2614_v10 }
  0x4c   :  { %1955 = vmatpush1.bf16.msra.mxu1 %v2617_v14  ;;  %1925 = vmatprep.subr.bf16.mxu0 %v2621_v18 }
  0x4d   :  { %1957 = vmatprep.subr.bf16.mxu1 %v2623_v19  ;;  %618 = vmatprep.mubr.f32.mxu0 %v3262_v0 }
  0x4e   :  { %82 = vperm.xlu1 %2407, %v55_v1   ;;  %689 = vmatprep.mubr.f32.mxu1 %v3262_v0 }
  0x4f   :  { %172 = vperm.xlu0 %2404, %v55_v1   ;;  %1927 = vmatpush1.bf16.msra.mxu0 %v2626_v23 }
  0x50   :  { %1959 = vmatpush1.bf16.msra.mxu1 %v2630_v27  ;;  %1929 = vmatprep.subr.bf16.mxu0 %v2632_v28 }
  0x51   :  { %1961 = vmatprep.subr.bf16.mxu1 %v2634_v32 }
  0x52   :  { %87 = vperm.xlu1 %2407, %v56_v59  }
  0x53   :  { %176 = vperm.xlu0 %2404, %v56_v59   ;;  %1931 = vmatpush1.bf16.msra.mxu0 %v2637_v36 }
  0x54   :  { %1963 = vmatpush1.bf16.msra.mxu1 %v2641_v40  ;;  %1933 = vmatprep.subr.bf16.mxu0 %v2643_v41 }
  0x55   :  { %1965 = vmatprep.subr.bf16.mxu1 %v2646_v45 }
  0x56   :  { %92 = vperm.xlu1 %2407, %v57_v60  }
  0x57   :  { %180 = vperm.xlu0 %2404, %v57_v60   ;;  %1935 = vmatpush1.bf16.msra.mxu0 %v2649_v52 }
  0x58   :  { %1967 = vmatpush1.bf16.msra.mxu1 %v2653_v53  ;;  %1937 = vmatprep.subr.bf16.mxu0 %v2655_v54 }
  0x59   :  { %1969 = vmatprep.subr.bf16.mxu1 %v2658_v58 }
  0x5a   :  { %97 = vperm.xlu1 %2407, %v58_v61  }
  0x5b   :  { %184 = vperm.xlu0 %2404, %v58_v61   ;;  %1939 = vmatpush1.bf16.msra.mxu0 %v2661_v2 }
  0x5c   :  { %1971 = vmatpush1.bf16.msra.mxu1 %v2665_v3  ;;  %1941 = vmatprep.subr.bf16.mxu0 %v2667_v4 }
  0x5d   :  { %1973 = vmatprep.subr.bf16.mxu1 %v2670_v11 }
  0x5f   :  { %1943 = vmatpush1.bf16.msra.mxu0 %v2673_v20 }
  0x60   :  { %1975 = vmatpush1.bf16.msra.mxu1 %v2677_v24  ;;  %1945 = vmatprep.subr.bf16.mxu0 %v2679_v25 }
  0x61   :  { %1977 = vmatprep.subr.bf16.mxu1 %v2688_v31 }
  0x63   :  { %1947 = vmatpush1.bf16.msra.mxu0 %v2691_v39 }
  0x64   :  { %1979 = vmatpush1.bf16.msra.mxu1 %v2695_v42  ;;  %1949 = vmatprep.subr.bf16.mxu0 %v2697_v43 }
  0x65   :  { %1981 = vmatprep.subr.bf16.mxu1 %v2700_v47 }
  0x67   :  { %1951 = vmatpush1.bf16.msra.mxu0 %v2703_v51 }
  0x68   :  { %1983 = vmatpush1.bf16.msra.mxu1 %v2707_v55  ;;  %1985 = vmatprep.subr.bf16.mxu0 %v2610_v5 }
  0x69   :  { %2017 = vmatprep.subr.bf16.mxu1 %v2612_v9 }
  0xb9   :  { %v2772_v8 = vpop.permute.xlu1 %67  ;;  %v2774_v12 = vpop.permute.xlu0 %62 }
  0xba   :  { %3277 = vst [vmem:[#allocation11_spill] sm:$0xff] %v2772_v8  ;;  %v125_v16 = vmul.f32 %v2779_v15, %v2772_v8 }
  0xbe   :  { %v2791_v29 = vpop.permute.xlu1 %160 }
  0xbf   :  { %3278 = vst [vmem:[#allocation12_spill] sm:$0xff] %v2791_v29  ;;  %v212_v33 = vmul.f32 %v2783_v17, %v2791_v29 }
  0xc0   :  { %v2800_v34 = vpop.permute.xlu0 %156 }
  0xc1   :  { %v244_v37 = vadd.f32 %v212_v33, %v125_v16 }
  0xc3   :  { %v2824_v57 = vadd.f32 %v2803_v35, %v244_v37 }
  0xc4   :  { %v73_v56 = vpop.permute.xlu1 %72 }
  0xc5   :  { %3279 = vst [vmem:[#allocation13_spill] sm:$0xff] %v2824_v57  ;;  %v129_v1 = vmul.f32 %v2779_v15, %v73_v56  ;;  %v130_v59 = vmul.f32 %v2806_v38, %v73_v56  ;;  %v131_v60 = vmul.f32 %v2809_v44, %v73_v56  ;;  %v132_v61 = vmul.f32 %v2812_v46, %v73_v56  ;;  %v165_v62 = vpop.permute.xlu0 %164 }
  0xc6   :  { %v216_v63 = vmul.f32 %v2783_v17, %v165_v62  ;;  %v217_v6 = vmul.f32 %v2815_v48, %v165_v62  ;;  %v218_v7 = vmul.f32 %v2818_v49, %v165_v62  ;;  %v219_v13 = vmul.f32 %v2821_v50, %v165_v62 }
  0xc8   :  { %v78_v16 = vpop.permute.xlu1 %77  ;;  %v248_v33 = vadd.f32 %v216_v63, %v129_v1  ;;  %v2834_v37 = vadd.f32 %v218_v7, %v131_v60  ;;  %v2836_v0 = vadd.f32 %v217_v6, %v130_v59  ;;  %v2838_v57 = vadd.f32 %v219_v13, %v132_v61 }
  0xc9   :  { %v133_v29 = vmul.f32 %v2779_v15, %v78_v16  ;;  %v134_v56 = vmul.f32 %v2806_v38, %v78_v16  ;;  %v135_v8 = vmul.f32 %v2809_v44, %v78_v16  ;;  %v136_v9 = vmul.f32 %v2812_v46, %v78_v16  ;;  %v169_v5 = vpop.permute.xlu0 %168 }
  0xca   :  { %3280 = vst [vmem:[#allocation14_spill] sm:$0xff] %v2834_v37  ;;  %3281 = vst [vmem:[#allocation15_spill] sm:$0xff] %v2836_v0  ;;  %v220_v55 = vmul.f32 %v2783_v17, %v169_v5  ;;  %v221_v62 = vmul.f32 %v2815_v48, %v169_v5  ;;  %v222_v1 = vmul.f32 %v2818_v49, %v169_v5 }
  0xcb   :  { %3282 = vst [vmem:[#allocation16_spill] sm:$0xff] %v2838_v57  ;;  %v223_v59 = vmul.f32 %v2821_v50, %v169_v5  ;;  %v2849_v60 = vadd.f32 %v2803_v35, %v248_v33 }
  0xcc   :  { %v252_v63 = vadd.f32 %v220_v55, %v133_v29  ;;  %v2851_v6 = vadd.f32 %v222_v1, %v135_v8  ;;  %v2853_v7 = vadd.f32 %v221_v62, %v134_v56 }
  0xcd   :  { %3283 = vst [vmem:[#allocation17_spill] sm:$0xff] %v2849_v60  ;;  %v83_v61 = vpop.permute.xlu1 %82  ;;  %v2855_v13 = vadd.f32 %v223_v59, %v136_v9 }
  0xce   :  { %3284 = vst [vmem:[#allocation18_spill] sm:$0xff] %v2851_v6  ;;  %3285 = vst [vmem:[#allocation19_spill] sm:$0xff] %v2853_v7  ;;  %v137_v16 = vmul.f32 %v2779_v15, %v83_v61  ;;  %v138_v57 = vmul.f32 %v2806_v38, %v83_v61  ;;  %v139_v0 = vmul.f32 %v2809_v44, %v83_v61  ;;  %v173_v5 = vpop.permute.xlu0 %172 }
  0xcf   :  { %3286 = vst [vmem:[#allocation20_spill] sm:$0xff] %v2855_v13  ;;  %v140_v37 = vmul.f32 %v2812_v46, %v83_v61  ;;  %v224_v33 = vmul.f32 %v2783_v17, %v173_v5  ;;  %v225_v60 = vmul.f32 %v2815_v48, %v173_v5  ;;  %v226_v55 = vmul.f32 %v2818_v49, %v173_v5 }
  0xd0   :  { %v227_v8 = vmul.f32 %v2821_v50, %v173_v5  ;;  %v2866_v9 = vadd.f32 %v2803_v35, %v252_v63 }
  0xd1   :  { %v88_v29 = vpop.permute.xlu1 %87  ;;  %v256_v56 = vadd.f32 %v224_v33, %v137_v16  ;;  %v2868_v62 = vadd.f32 %v226_v55, %v139_v0  ;;  %v2870_v1 = vadd.f32 %v225_v60, %v138_v57 }
  0xd2   :  { %3287 = vst [vmem:[#allocation21_spill] sm:$0xff] %v2866_v9  ;;  %v2872_v59 = vadd.f32 %v227_v8, %v140_v37  ;;  %v141_v61 = vmul.f32 %v2779_v15, %v88_v29  ;;  %v142_v13 = vmul.f32 %v2806_v38, %v88_v29  ;;  %v143_v7 = vmul.f32 %v2809_v44, %v88_v29  ;;  %v177_v5 = vpop.permute.xlu0 %176 }
  0xd3   :  { %3288 = vst [vmem:[#allocation22_spill] sm:$0xff] %v2868_v62  ;;  %3289 = vst [vmem:[#allocation23_spill] sm:$0xff] %v2870_v1  ;;  %v144_v6 = vmul.f32 %v2812_v46, %v88_v29  ;;  %v228_v63 = vmul.f32 %v2783_v17, %v177_v5  ;;  %v229_v9 = vmul.f32 %v2815_v48, %v177_v5 }
  0xd4   :  { %3290 = vst [vmem:[#allocation24_spill] sm:$0xff] %v2872_v59  ;;  %v230_v0 = vmul.f32 %v2818_v49, %v177_v5  ;;  %v231_v57 = vmul.f32 %v2821_v50, %v177_v5  ;;  %v2883_v37 = vadd.f32 %v2803_v35, %v256_v56 }
  0xd5   :  { %v93_v60 = vpop.permute.xlu1 %92  ;;  %v260_v16 = vadd.f32 %v228_v63, %v141_v61  ;;  %v2887_v55 = vadd.f32 %v229_v9, %v142_v13 }
  0xd6   :  { %3291 = vst [vmem:[#allocation25_spill] sm:$0xff] %v2883_v37  ;;  %v2885_v33 = vadd.f32 %v230_v0, %v143_v7  ;;  %v2889_v8 = vadd.f32 %v231_v57, %v144_v6  ;;  %v145_v29 = vmul.f32 %v2779_v15, %v93_v60  ;;  %v146_v59 = vmul.f32 %v2806_v38, %v93_v60  ;;  %v181_v5 = vpop.permute.xlu0 %180 }
  0xd7   :  { %3293 = vst [vmem:[#allocation27_spill] sm:$0xff] %v2887_v55  ;;  %v147_v1 = vmul.f32 %v2809_v44, %v93_v60  ;;  %v148_v62 = vmul.f32 %v2812_v46, %v93_v60  ;;  %v232_v56 = vmul.f32 %v2783_v17, %v181_v5  ;;  %v233_v37 = vmul.f32 %v2815_v48, %v181_v5 }
  0xd8   :  { %3292 = vst [vmem:[#allocation26_spill] sm:$0xff] %v2885_v33  ;;  %3294 = vst [vmem:[#allocation28_spill] sm:$0xff] %v2889_v8  ;;  %v234_v7 = vmul.f32 %v2818_v49, %v181_v5  ;;  %v235_v13 = vmul.f32 %v2821_v50, %v181_v5  ;;  %v2900_v6 = vadd.f32 %v2803_v35, %v260_v16 }
  0xd9   :  { %v98_v9 = vpop.permute.xlu1 %97  ;;  %v264_v61 = vadd.f32 %v232_v56, %v145_v29  ;;  %v2904_v0 = vadd.f32 %v233_v37, %v146_v59 }
  0xda   :  { %3295 = vst [vmem:[#allocation29_spill] sm:$0xff] %v2900_v6  ;;  %v2902_v63 = vadd.f32 %v234_v7, %v147_v1  ;;  %v2906_v57 = vadd.f32 %v235_v13, %v148_v62  ;;  %v149_v60 = vmul.f32 %v2779_v15, %v98_v9  ;;  %v150_v8 = vmul.f32 %v2806_v38, %v98_v9  ;;  %v185_v5 = vpop.permute.xlu0 %184 }
  0xdb   :  { %v151_v55 = vmul.f32 %v2809_v44, %v98_v9  ;;  %v152_v33 = vmul.f32 %v2812_v46, %v98_v9  ;;  %v236_v16 = vmul.f32 %v2783_v17, %v185_v5  ;;  %v237_v6 = vmul.f32 %v2815_v48, %v185_v5 }
  0xdc   :  { %3296 = vst [vmem:[#allocation30_spill] sm:$0xff] %v2906_v57  ;;  %v238_v1 = vmul.f32 %v2818_v49, %v185_v5  ;;  %v239_v59 = vmul.f32 %v2821_v50, %v185_v5  ;;  %v2917_v62 = vadd.f32 %v2803_v35, %v264_v61  ;;  %v121_v9 = vmul.f32 %v2779_v15, %v2774_v12 }
  0xdd   :  { %v268_v37 = vadd.f32 %v236_v16, %v149_v60  ;;  %v2921_v56 = vadd.f32 %v237_v6, %v150_v8  ;;  %v208_v57 = vmul.f32 %v2783_v17, %v2800_v34  ;;  %v122_v61 = vmul.f32 %v2806_v38, %v2774_v12 }
  0xde   :  { %v2919_v29 = vadd.f32 %v238_v1, %v151_v55  ;;  %v2923_v7 = vadd.f32 %v239_v59, %v152_v33  ;;  %v209_v55 = vmul.f32 %v2815_v48, %v2800_v34  ;;  %v123_v8 = vmul.f32 %v2809_v44, %v2774_v12 }
  0xdf   :  { %3298 = vst [vmem:[#allocation32_spill] sm:$0xff] %v2921_v56  ;;  %v2926_v13 = vadd.f32 %v2803_v35, %v268_v37  ;;  %v210_v33 = vmul.f32 %v2818_v49, %v2800_v34  ;;  %v240_v6 = vadd.f32 %v208_v57, %v121_v9  ;;  %v2942_v15 = vrot.slane %v2796_v30, %v2785_v21 }
  0xe0   :  { %3297 = vst [vmem:[#allocation31_spill] sm:$0xff] %v2919_v29  ;;  %3299 = vst [vmem:[#allocation33_spill] sm:$0xff] %v2923_v7  ;;  %v241_v60 = vadd.f32 %v209_v55, %v122_v61  ;;  %v2946_v17 = vrot.slane %v2796_v30, %v2787_v22  ;;  %v124_v5 = vmul.f32 %v2812_v46, %v2774_v12 }
  0xe1   :  { %3300 = vst [vmem:[#allocation34_spill] sm:$0xff] %v2926_v13  ;;  %v211_v16 = vmul.f32 %v2821_v50, %v2800_v34  ;;  %v294_v1 = vadd.f32 %v2803_v35, %v240_v6  ;;  %v242_v59 = vadd.f32 %v210_v33, %v123_v8  ;;  %v2957_v12 = vrot.slane %v2796_v30, %v2789_v26 }
  0xe2   :  { %v295_v57 = vadd.f32 %v2942_v15, %v241_v60 }
  0xe3   :  { %v296_v22 = vadd.f32 %v2946_v17, %v242_v59  ;;  %v243_v56 = vadd.f32 %v211_v16, %v124_v5 }
  0xe5   :  { %v297_v8 = vadd.f32 %v2957_v12, %v243_v56 }
 0x11d   :  { %v456_v37 = vpop.f32.mrb[0].mxu0 }
 0x11e   :  { %v532_v9 = vadd.f32 %v456_v37, %v294_v1  ;;  %v527_v61 = vpop.f32.mrb[0].mxu1  ;;  %v458_v21 = vpop.f32.mrb[1].mxu0 }
 0x11f   :  { %v533_v55 = vadd.f32 %v458_v21, %v295_v57  ;;  %v529_v13 = vpop.f32.mrb[1].mxu1  ;;  %v534_v35 = vadd.f32 %v527_v61, %v296_v22  ;;  %v3302_v22 = vld [vmem:[#allocation10_spill] sm:$0xff] }
 0x120   :  { %v536_v7 = vmul.f32 0.5, %v532_v9  ;;  %v535_v33 = vadd.f32 %v529_v13, %v297_v8  ;;  %v3305_v8 = vld [vmem:[#allocation11_spill] sm:$0xff] }
 0x121   :  { %v540_v34 = vmul.f32 0.5, %v533_v55  ;;  %v3301_v55 = vmov 0.0  }
 0x122   :  { %2408 = vtanh.f32 %v536_v7  ;;  %v545_v6 = vmul.f32 0.5, %v535_v33  ;;  %v126_v33 = vmul.f32 %v2806_v38, %v3305_v8 }
 0x123   :  { %2410 = vtanh.f32 %v540_v34  ;;  %v3303_v34 = vld [vmem:[#allocation8_spill] sm:$0xff] }
 0x124   :  { %2412 = vtanh.f32 %v534_v35  ;;  %v3304_v35 = vld [vmem:[#allocation9_spill] sm:$0xff] }
 0x125   :  { %2414 = vtanh.f32 %v545_v6  ;;  %v127_v6 = vmul.f32 %v2809_v44, %v3305_v8 }
 0x12c   :  { %v2409_v60 = vpop.eup %2408 }
 0x12d   :  { %v2411_v1 = vpop.eup %2410  ;;  %v538_v37 = vmul.f32 0.5, %v2409_v60  ;;  %v128_v60 = vmul.f32 %v2812_v46, %v3305_v8 }
 0x12e   :  { %v542_v57 = vmul.f32 0.5, %v2411_v1  ;;  %v2413_v5 = vpop.eup %2412  ;;  %v3306_v1 = vld [vmem:[#allocation12_spill] sm:$0xff] }
 0x12f   :  { %v539_v59 = vadd.f32 0.5, %v538_v37  ;;  %v2415_v7 = vpop.eup %2414  ;;  %v213_v37 = vmul.f32 %v2815_v48, %v3306_v1 }
 0x130   :  { %v543_v16 = vadd.f32 0.5, %v542_v57  ;;  %v547_v61 = vmul.f32 0.5, %v2415_v7  ;;  %v214_v57 = vmul.f32 %v2818_v49, %v3306_v1 }
 0x131   :  { %v550_v9 = vmul.f32 %v2413_v5, %v539_v59  ;;  %v215_v59 = vmul.f32 %v2821_v50, %v3306_v1 }
 0x132   :  { %v549_v26 = vmul.f32 0.0, %v543_v16  ;;  %v548_v56 = vadd.f32 0.5, %v547_v61  ;;  %v246_v5 = vadd.f32 %v214_v57, %v127_v6  ;;  %v245_v16 = vadd.f32 %v213_v37, %v126_v33  ;;  %v3307_v61 = vld [vmem:[#allocation13_spill] sm:$0xff] }
 0x134   :  { %v2960_v30 = vadd.f32 %v550_v9, %v549_v26  ;;  %v247_v9 = vadd.f32 %v215_v59, %v128_v60  ;;  %v300_v38 = vadd.f32 %v2946_v17, %v246_v5  ;;  %v299_v44 = vadd.f32 %v2942_v15, %v245_v16 }
 0x136   :  { %2416 = vtanh.f32 %v2960_v30  ;;  %v301_v46 = vadd.f32 %v2957_v12, %v247_v9 }
 0x140   :  { %v2417_v21 = vpop.eup %2416 }
 0x141   :  { %v553_v13 = vmul.f32 %v2417_v21, %v548_v56 }
 0x143   :  { %619 = vmatmul.mubr.f32.vlgmr.msra.gmra.mrb[2].mxu0 %v553_v13  ;;  %690 = vmatmul.mubr.f32.vlgmr.msra.gmra.mrb[2].mxu1 %v553_v13 }
 0x144   :  { %1987 = vmatpush1.bf16.msra.mxu0 %v2614_v10  ;;  %2019 = vmatpush1.bf16.msra.mxu1 %v2617_v14 }
 0x145   :  { %1989 = vmatprep.subr.bf16.mxu0 %v2621_v18  ;;  %2021 = vmatprep.subr.bf16.mxu1 %v2623_v19 }
 0x146   :  { %782 = vmatprep.mubr.f32.mxu0 %v3301_v55  ;;  %853 = vmatprep.mubr.f32.mxu1 %v3301_v55 }
 0x148   :  { %1991 = vmatpush1.bf16.msra.mxu0 %v2626_v23  ;;  %2023 = vmatpush1.bf16.msra.mxu1 %v2630_v27 }
 0x149   :  { %1993 = vmatprep.subr.bf16.mxu0 %v2632_v28  ;;  %2025 = vmatprep.subr.bf16.mxu1 %v2634_v32 }
 0x14c   :  { %1995 = vmatpush1.bf16.msra.mxu0 %v2637_v36  ;;  %2027 = vmatpush1.bf16.msra.mxu1 %v2641_v40 }
 0x14d   :  { %1997 = vmatprep.subr.bf16.mxu0 %v2643_v41  ;;  %2029 = vmatprep.subr.bf16.mxu1 %v2646_v45 }
 0x150   :  { %1999 = vmatpush1.bf16.msra.mxu0 %v2649_v52  ;;  %2031 = vmatpush1.bf16.msra.mxu1 %v2653_v53 }
 0x151   :  { %2001 = vmatprep.subr.bf16.mxu0 %v2655_v54  ;;  %2033 = vmatprep.subr.bf16.mxu1 %v2658_v58 }
 0x154   :  { %2003 = vmatpush1.bf16.msra.mxu0 %v2661_v2  ;;  %2035 = vmatpush1.bf16.msra.mxu1 %v2665_v3 }
 0x155   :  { %2005 = vmatprep.subr.bf16.mxu0 %v2667_v4  ;;  %2037 = vmatprep.subr.bf16.mxu1 %v2670_v11 }
 0x158   :  { %2007 = vmatpush1.bf16.msra.mxu0 %v2673_v20  ;;  %2039 = vmatpush1.bf16.msra.mxu1 %v2677_v24 }
 0x159   :  { %2009 = vmatprep.subr.bf16.mxu0 %v2679_v25  ;;  %2041 = vmatprep.subr.bf16.mxu1 %v2688_v31 }
 0x15c   :  { %2011 = vmatpush1.bf16.msra.mxu0 %v2691_v39  ;;  %2043 = vmatpush1.bf16.msra.mxu1 %v2695_v42 }
 0x15d   :  { %2013 = vmatprep.subr.bf16.mxu0 %v2697_v43  ;;  %2045 = vmatprep.subr.bf16.mxu1 %v2700_v47 }
 0x160   :  { %2015 = vmatpush1.bf16.msra.mxu0 %v2703_v51  ;;  %2047 = vmatpush1.bf16.msra.mxu1 %v3302_v22 }
 0x161   :  { %2049 = vmatprep.subr.bf16.mxu0 %v3303_v34  ;;  %2081 = vmatprep.subr.bf16.mxu1 %v3304_v35 }
 0x216   :  { %v620_v26 = vpop.f32.mrb[2].mxu0  ;;  %v691_v7 = vpop.f32.mrb[2].mxu1 }
 0x217   :  { %v696_v56 = vadd.f32 %v620_v26, %v3307_v61  ;;  %v698_v48 = vadd.f32 %v691_v7, %v300_v38  ;;  %v622_v21 = vpop.f32.mrb[3].mxu0  ;;  %v693_v13 = vpop.f32.mrb[3].mxu1 }
 0x218   :  { %v697_v49 = vadd.f32 %v622_v21, %v299_v44  ;;  %v699_v8 = vadd.f32 %v693_v13, %v301_v46  ;;  %v3309_v21 = vld [vmem:[#allocation15_spill] sm:$0xff] }
 0x219   :  { %v700_v29 = vmul.f32 0.5, %v696_v56  ;;  %v303_v13 = vadd.f32 %v2942_v15, %v3309_v21 }
 0x21a   :  { %v704_v50 = vmul.f32 0.5, %v697_v49  ;;  %v709_v33 = vmul.f32 0.5, %v699_v8  ;;  %v3310_v49 = vld [vmem:[#allocation16_spill] sm:$0xff] }
 0x21b   :  { %2418 = vtanh.f32 %v700_v29  ;;  %v305_v8 = vadd.f32 %v2957_v12, %v3310_v49 }
 0x21c   :  { %2420 = vtanh.f32 %v704_v50  ;;  %v3311_v50 = vld [vmem:[#allocation17_spill] sm:$0xff] }
 0x21d   :  { %2422 = vtanh.f32 %v698_v48 }
 0x21e   :  { %2424 = vtanh.f32 %v709_v33 }
 0x225   :  { %v2419_v6 = vpop.eup %2418 }
 0x226   :  { %v2421_v60 = vpop.eup %2420  ;;  %v702_v1 = vmul.f32 0.5, %v2419_v6 }
 0x227   :  { %v706_v37 = vmul.f32 0.5, %v2421_v60  ;;  %v2423_v59 = vpop.eup %2422 }
 0x228   :  { %v703_v57 = vadd.f32 0.5, %v702_v1  ;;  %v2425_v26 = vpop.eup %2424 }
 0x229   :  { %v707_v5 = vadd.f32 0.5, %v706_v37  ;;  %v711_v29 = vmul.f32 0.5, %v2425_v26 }
 0x22a   :  { %v714_v16 = vmul.f32 %v2423_v59, %v703_v57 }
 0x22b   :  { %v713_v9 = vmul.f32 %v707_v5, %v2960_v30  ;;  %v712_v7 = vadd.f32 0.5, %v711_v29  ;;  %v3308_v30 = vld [vmem:[#allocation14_spill] sm:$0xff] }
 0x22c   :  { %v304_v61 = vadd.f32 %v2946_v17, %v3308_v30 }
 0x22d   :  { %v3014_v38 = vadd.f32 %v714_v16, %v713_v9 }
 0x22f   :  { %2426 = vtanh.f32 %v3014_v38 }
 0x239   :  { %v2427_v44 = vpop.eup %2426 }
 0x23a   :  { %v717_v46 = vmul.f32 %v2427_v44, %v712_v7 }
 0x23c   :  { %783 = vmatmul.mubr.f32.vlgmr.msra.gmra.mrb[4].mxu0 %v717_v46  ;;  %854 = vmatmul.mubr.f32.vlgmr.msra.gmra.mrb[4].mxu1 %v717_v46 }
 0x23d   :  { %2051 = vmatpush1.bf16.msra.mxu0 %v2614_v10  ;;  %2083 = vmatpush1.bf16.msra.mxu1 %v2617_v14 }
 0x23e   :  { %2053 = vmatprep.subr.bf16.mxu0 %v2621_v18  ;;  %2085 = vmatprep.subr.bf16.mxu1 %v2623_v19 }
 0x23f   :  { %946 = vmatprep.mubr.f32.mxu0 %v3301_v55  ;;  %1017 = vmatprep.mubr.f32.mxu1 %v3301_v55 }
 0x241   :  { %2055 = vmatpush1.bf16.msra.mxu0 %v2626_v23  ;;  %2087 = vmatpush1.bf16.msra.mxu1 %v2630_v27 }
 0x242   :  { %2057 = vmatprep.subr.bf16.mxu0 %v2632_v28  ;;  %2089 = vmatprep.subr.bf16.mxu1 %v2634_v32 }
 0x245   :  { %2059 = vmatpush1.bf16.msra.mxu0 %v2637_v36  ;;  %2091 = vmatpush1.bf16.msra.mxu1 %v2641_v40 }
 0x246   :  { %2061 = vmatprep.subr.bf16.mxu0 %v2643_v41  ;;  %2093 = vmatprep.subr.bf16.mxu1 %v2646_v45 }
 0x249   :  { %2063 = vmatpush1.bf16.msra.mxu0 %v2649_v52  ;;  %2095 = vmatpush1.bf16.msra.mxu1 %v2653_v53 }
 0x24a   :  { %2065 = vmatprep.subr.bf16.mxu0 %v2655_v54  ;;  %2097 = vmatprep.subr.bf16.mxu1 %v2658_v58 }
 0x24d   :  { %2067 = vmatpush1.bf16.msra.mxu0 %v2661_v2  ;;  %2099 = vmatpush1.bf16.msra.mxu1 %v2665_v3 }
 0x24e   :  { %2069 = vmatprep.subr.bf16.mxu0 %v2667_v4  ;;  %2101 = vmatprep.subr.bf16.mxu1 %v2670_v11 }
 0x251   :  { %2071 = vmatpush1.bf16.msra.mxu0 %v2673_v20  ;;  %2103 = vmatpush1.bf16.msra.mxu1 %v2677_v24 }
 0x252   :  { %2073 = vmatprep.subr.bf16.mxu0 %v2679_v25  ;;  %2105 = vmatprep.subr.bf16.mxu1 %v2688_v31 }
 0x255   :  { %2075 = vmatpush1.bf16.msra.mxu0 %v2691_v39  ;;  %2107 = vmatpush1.bf16.msra.mxu1 %v2695_v42 }
 0x256   :  { %2077 = vmatprep.subr.bf16.mxu0 %v2697_v43  ;;  %2109 = vmatprep.subr.bf16.mxu1 %v2700_v47 }
 0x259   :  { %2079 = vmatpush1.bf16.msra.mxu0 %v2703_v51  ;;  %2111 = vmatpush1.bf16.msra.mxu1 %v3302_v22 }
 0x25a   :  { %2113 = vmatprep.subr.bf16.mxu0 %v3303_v34  ;;  %2145 = vmatprep.subr.bf16.mxu1 %v3304_v35 }
 0x30f   :  { %v784_v56 = vpop.f32.mrb[4].mxu0  ;;  %v855_v48 = vpop.f32.mrb[4].mxu1 }
 0x310   :  { %v860_v33 = vadd.f32 %v784_v56, %v3311_v50  ;;  %v862_v6 = vadd.f32 %v855_v48, %v304_v61  ;;  %v786_v60 = vpop.f32.mrb[5].mxu0  ;;  %v857_v1 = vpop.f32.mrb[5].mxu1 }
 0x311   :  { %v861_v37 = vadd.f32 %v786_v60, %v303_v13  ;;  %v863_v57 = vadd.f32 %v857_v1, %v305_v8  ;;  %v3313_v1 = vld [vmem:[#allocation19_spill] sm:$0xff] }
 0x312   :  { %v864_v59 = vmul.f32 0.5, %v860_v33 }
 0x313   :  { %v868_v5 = vmul.f32 0.5, %v861_v37  ;;  %v873_v16 = vmul.f32 0.5, %v863_v57  ;;  %v307_v37 = vadd.f32 %v2942_v15, %v3313_v1  ;;  %v3314_v57 = vld [vmem:[#allocation20_spill] sm:$0xff] }
 0x314   :  { %2428 = vtanh.f32 %v864_v59  ;;  %v309_v59 = vadd.f32 %v2957_v12, %v3314_v57 }
 0x315   :  { %2430 = vtanh.f32 %v868_v5  ;;  %v3315_v5 = vld [vmem:[#allocation21_spill] sm:$0xff] }
 0x316   :  { %2432 = vtanh.f32 %v862_v6 }
 0x317   :  { %2434 = vtanh.f32 %v873_v16 }
 0x31e   :  { %v2429_v9 = vpop.eup %2428 }
 0x31f   :  { %v2431_v26 = vpop.eup %2430  ;;  %v866_v29 = vmul.f32 0.5, %v2429_v9 }
 0x320   :  { %v870_v7 = vmul.f32 0.5, %v2431_v26  ;;  %v2433_v46 = vpop.eup %2432 }
 0x321   :  { %v867_v44 = vadd.f32 0.5, %v866_v29  ;;  %v2435_v21 = vpop.eup %2434 }
 0x322   :  { %v871_v30 = vadd.f32 0.5, %v870_v7  ;;  %v875_v13 = vmul.f32 0.5, %v2435_v21 }
 0x323   :  { %v878_v56 = vmul.f32 %v2433_v46, %v867_v44 }
 0x324   :  { %v877_v61 = vmul.f32 %v871_v30, %v3014_v38  ;;  %v876_v49 = vadd.f32 0.5, %v875_v13  ;;  %v3312_v38 = vld [vmem:[#allocation18_spill] sm:$0xff] }
 0x325   :  { %v308_v33 = vadd.f32 %v2946_v17, %v3312_v38 }
 0x326   :  { %v3059_v48 = vadd.f32 %v878_v56, %v877_v61 }
 0x328   :  { %2436 = vtanh.f32 %v3059_v48 }
 0x332   :  { %v2437_v8 = vpop.eup %2436 }
 0x333   :  { %v881_v50 = vmul.f32 %v2437_v8, %v876_v49 }
 0x335   :  { %947 = vmatmul.mubr.f32.vlgmr.msra.gmra.mrb[6].mxu0 %v881_v50  ;;  %1018 = vmatmul.mubr.f32.vlgmr.msra.gmra.mrb[6].mxu1 %v881_v50 }
 0x336   :  { %2115 = vmatpush1.bf16.msra.mxu0 %v2614_v10  ;;  %2147 = vmatpush1.bf16.msra.mxu1 %v2617_v14 }
 0x337   :  { %2117 = vmatprep.subr.bf16.mxu0 %v2621_v18  ;;  %2149 = vmatprep.subr.bf16.mxu1 %v2623_v19 }
 0x338   :  { %1110 = vmatprep.mubr.f32.mxu0 %v3301_v55  ;;  %1181 = vmatprep.mubr.f32.mxu1 %v3301_v55 }
 0x33a   :  { %2119 = vmatpush1.bf16.msra.mxu0 %v2626_v23  ;;  %2151 = vmatpush1.bf16.msra.mxu1 %v2630_v27 }
 0x33b   :  { %2121 = vmatprep.subr.bf16.mxu0 %v2632_v28  ;;  %2153 = vmatprep.subr.bf16.mxu1 %v2634_v32 }
 0x33e   :  { %2123 = vmatpush1.bf16.msra.mxu0 %v2637_v36  ;;  %2155 = vmatpush1.bf16.msra.mxu1 %v2641_v40 }
 0x33f   :  { %2125 = vmatprep.subr.bf16.mxu0 %v2643_v41  ;;  %2157 = vmatprep.subr.bf16.mxu1 %v2646_v45 }
 0x342   :  { %2127 = vmatpush1.bf16.msra.mxu0 %v2649_v52  ;;  %2159 = vmatpush1.bf16.msra.mxu1 %v2653_v53 }
 0x343   :  { %2129 = vmatprep.subr.bf16.mxu0 %v2655_v54  ;;  %2161 = vmatprep.subr.bf16.mxu1 %v2658_v58 }
 0x346   :  { %2131 = vmatpush1.bf16.msra.mxu0 %v2661_v2  ;;  %2163 = vmatpush1.bf16.msra.mxu1 %v2665_v3 }
 0x347   :  { %2133 = vmatprep.subr.bf16.mxu0 %v2667_v4  ;;  %2165 = vmatprep.subr.bf16.mxu1 %v2670_v11 }
 0x34a   :  { %2135 = vmatpush1.bf16.msra.mxu0 %v2673_v20  ;;  %2167 = vmatpush1.bf16.msra.mxu1 %v2677_v24 }
 0x34b   :  { %2137 = vmatprep.subr.bf16.mxu0 %v2679_v25  ;;  %2169 = vmatprep.subr.bf16.mxu1 %v2688_v31 }
 0x34e   :  { %2139 = vmatpush1.bf16.msra.mxu0 %v2691_v39  ;;  %2171 = vmatpush1.bf16.msra.mxu1 %v2695_v42 }
 0x34f   :  { %2141 = vmatprep.subr.bf16.mxu0 %v2697_v43  ;;  %2173 = vmatprep.subr.bf16.mxu1 %v2700_v47 }
 0x352   :  { %2143 = vmatpush1.bf16.msra.mxu0 %v2703_v51  ;;  %2175 = vmatpush1.bf16.msra.mxu1 %v3302_v22 }
 0x353   :  { %2177 = vmatprep.subr.bf16.mxu0 %v3303_v34  ;;  %2209 = vmatprep.subr.bf16.mxu1 %v3304_v35 }
 0x408   :  { %v948_v6 = vpop.f32.mrb[6].mxu0  ;;  %v1019_v60 = vpop.f32.mrb[6].mxu1 }
 0x409   :  { %v1024_v16 = vadd.f32 %v948_v6, %v3315_v5  ;;  %v1026_v9 = vadd.f32 %v1019_v60, %v308_v33  ;;  %v950_v26 = vpop.f32.mrb[7].mxu0  ;;  %v1021_v29 = vpop.f32.mrb[7].mxu1 }
 0x40a   :  { %v1025_v7 = vadd.f32 %v950_v26, %v307_v37  ;;  %v1027_v44 = vadd.f32 %v1021_v29, %v309_v59  ;;  %v3317_v29 = vld [vmem:[#allocation23_spill] sm:$0xff] }
 0x40b   :  { %v1028_v46 = vmul.f32 0.5, %v1024_v16 }
 0x40c   :  { %v1032_v30 = vmul.f32 0.5, %v1025_v7  ;;  %v1037_v56 = vmul.f32 0.5, %v1027_v44  ;;  %v311_v7 = vadd.f32 %v2942_v15, %v3317_v29  ;;  %v3318_v44 = vld [vmem:[#allocation24_spill] sm:$0xff] }
 0x40d   :  { %2438 = vtanh.f32 %v1028_v46  ;;  %v313_v46 = vadd.f32 %v2957_v12, %v3318_v44 }
 0x40e   :  { %2440 = vtanh.f32 %v1032_v30  ;;  %v3319_v30 = vld [vmem:[#allocation25_spill] sm:$0xff] }
 0x40f   :  { %2442 = vtanh.f32 %v1026_v9 }
 0x410   :  { %2444 = vtanh.f32 %v1037_v56 }
 0x417   :  { %v2439_v61 = vpop.eup %2438 }
 0x418   :  { %v2441_v21 = vpop.eup %2440  ;;  %v1030_v13 = vmul.f32 0.5, %v2439_v61 }
 0x419   :  { %v1034_v49 = vmul.f32 0.5, %v2441_v21  ;;  %v2443_v50 = vpop.eup %2442 }
 0x41a   :  { %v1031_v8 = vadd.f32 0.5, %v1030_v13  ;;  %v2445_v1 = vpop.eup %2444 }
 0x41b   :  { %v1035_v38 = vadd.f32 0.5, %v1034_v49  ;;  %v1039_v37 = vmul.f32 0.5, %v2445_v1 }
 0x41c   :  { %v1042_v6 = vmul.f32 %v2443_v50, %v1031_v8 }
 0x41d   :  { %v1041_v33 = vmul.f32 %v1035_v38, %v3059_v48  ;;  %v1040_v57 = vadd.f32 0.5, %v1039_v37  ;;  %v3316_v48 = vld [vmem:[#allocation22_spill] sm:$0xff] }
 0x41e   :  { %v312_v16 = vadd.f32 %v2946_v17, %v3316_v48 }
 0x41f   :  { %v3104_v60 = vadd.f32 %v1042_v6, %v1041_v33 }
 0x421   :  { %2446 = vtanh.f32 %v3104_v60 }
 0x42b   :  { %v2447_v59 = vpop.eup %2446 }
 0x42c   :  { %v1045_v5 = vmul.f32 %v2447_v59, %v1040_v57 }
 0x42e   :  { %1111 = vmatmul.mubr.f32.vlgmr.msra.gmra.mrb[8].mxu0 %v1045_v5  ;;  %1182 = vmatmul.mubr.f32.vlgmr.msra.gmra.mrb[8].mxu1 %v1045_v5 }
 0x42f   :  { %2179 = vmatpush1.bf16.msra.mxu0 %v2614_v10  ;;  %2211 = vmatpush1.bf16.msra.mxu1 %v2617_v14 }
 0x430   :  { %2181 = vmatprep.subr.bf16.mxu0 %v2621_v18  ;;  %2213 = vmatprep.subr.bf16.mxu1 %v2623_v19 }
 0x431   :  { %1274 = vmatprep.mubr.f32.mxu0 %v3301_v55  ;;  %1345 = vmatprep.mubr.f32.mxu1 %v3301_v55 }
 0x433   :  { %2183 = vmatpush1.bf16.msra.mxu0 %v2626_v23  ;;  %2215 = vmatpush1.bf16.msra.mxu1 %v2630_v27 }
 0x434   :  { %2185 = vmatprep.subr.bf16.mxu0 %v2632_v28  ;;  %2217 = vmatprep.subr.bf16.mxu1 %v2634_v32 }
 0x437   :  { %2187 = vmatpush1.bf16.msra.mxu0 %v2637_v36  ;;  %2219 = vmatpush1.bf16.msra.mxu1 %v2641_v40 }
 0x438   :  { %2189 = vmatprep.subr.bf16.mxu0 %v2643_v41  ;;  %2221 = vmatprep.subr.bf16.mxu1 %v2646_v45 }
 0x43b   :  { %2191 = vmatpush1.bf16.msra.mxu0 %v2649_v52  ;;  %2223 = vmatpush1.bf16.msra.mxu1 %v2653_v53 }
 0x43c   :  { %2193 = vmatprep.subr.bf16.mxu0 %v2655_v54  ;;  %2225 = vmatprep.subr.bf16.mxu1 %v2658_v58 }
 0x43f   :  { %2195 = vmatpush1.bf16.msra.mxu0 %v2661_v2  ;;  %2227 = vmatpush1.bf16.msra.mxu1 %v2665_v3 }
 0x440   :  { %2197 = vmatprep.subr.bf16.mxu0 %v2667_v4  ;;  %2229 = vmatprep.subr.bf16.mxu1 %v2670_v11 }
 0x443   :  { %2199 = vmatpush1.bf16.msra.mxu0 %v2673_v20  ;;  %2231 = vmatpush1.bf16.msra.mxu1 %v2677_v24 }
 0x444   :  { %2201 = vmatprep.subr.bf16.mxu0 %v2679_v25  ;;  %2233 = vmatprep.subr.bf16.mxu1 %v2688_v31 }
 0x447   :  { %2203 = vmatpush1.bf16.msra.mxu0 %v2691_v39  ;;  %2235 = vmatpush1.bf16.msra.mxu1 %v2695_v42 }
 0x448   :  { %2205 = vmatprep.subr.bf16.mxu0 %v2697_v43  ;;  %2237 = vmatprep.subr.bf16.mxu1 %v2700_v47 }
 0x44b   :  { %2207 = vmatpush1.bf16.msra.mxu0 %v2703_v51  ;;  %2239 = vmatpush1.bf16.msra.mxu1 %v3302_v22 }
 0x44c   :  { %2241 = vmatprep.subr.bf16.mxu0 %v3303_v34  ;;  %2273 = vmatprep.subr.bf16.mxu1 %v3304_v35 }
 0x501   :  { %v1112_v9 = vpop.f32.mrb[8].mxu0  ;;  %v1183_v26 = vpop.f32.mrb[8].mxu1 }
 0x502   :  { %v1188_v56 = vadd.f32 %v1112_v9, %v3319_v30  ;;  %v1190_v61 = vadd.f32 %v1183_v26, %v312_v16  ;;  %v1114_v21 = vpop.f32.mrb[9].mxu0  ;;  %v1185_v13 = vpop.f32.mrb[9].mxu1 }
 0x503   :  { %v1189_v49 = vadd.f32 %v1114_v21, %v311_v7  ;;  %v1191_v8 = vadd.f32 %v1185_v13, %v313_v46  ;;  %v3321_v13 = vld [vmem:[#allocation27_spill] sm:$0xff] }
 0x504   :  { %v1192_v50 = vmul.f32 0.5, %v1188_v56 }
 0x505   :  { %v1196_v38 = vmul.f32 0.5, %v1189_v49  ;;  %v1201_v6 = vmul.f32 0.5, %v1191_v8  ;;  %v315_v49 = vadd.f32 %v2942_v15, %v3321_v13  ;;  %v3322_v8 = vld [vmem:[#allocation28_spill] sm:$0xff] }
 0x506   :  { %2448 = vtanh.f32 %v1192_v50  ;;  %v317_v50 = vadd.f32 %v2957_v12, %v3322_v8 }
 0x507   :  { %2450 = vtanh.f32 %v1196_v38  ;;  %v3323_v38 = vld [vmem:[#allocation29_spill] sm:$0xff] }
 0x508   :  { %2452 = vtanh.f32 %v1190_v61 }
 0x509   :  { %2454 = vtanh.f32 %v1201_v6 }
 0x510   :  { %v2449_v33 = vpop.eup %2448 }
 0x511   :  { %v2451_v1 = vpop.eup %2450  ;;  %v1194_v37 = vmul.f32 0.5, %v2449_v33 }
 0x512   :  { %v1198_v57 = vmul.f32 0.5, %v2451_v1  ;;  %v2453_v5 = vpop.eup %2452 }
 0x513   :  { %v1195_v59 = vadd.f32 0.5, %v1194_v37  ;;  %v2455_v29 = vpop.eup %2454 }
 0x514   :  { %v1199_v48 = vadd.f32 0.5, %v1198_v57  ;;  %v1203_v7 = vmul.f32 0.5, %v2455_v29 }
 0x515   :  { %v1206_v9 = vmul.f32 %v2453_v5, %v1195_v59 }
 0x516   :  { %v1205_v16 = vmul.f32 %v1199_v48, %v3104_v60  ;;  %v1204_v44 = vadd.f32 0.5, %v1203_v7  ;;  %v3320_v60 = vld [vmem:[#allocation26_spill] sm:$0xff] }
 0x517   :  { %v316_v56 = vadd.f32 %v2946_v17, %v3320_v60 }
 0x518   :  { %v3149_v26 = vadd.f32 %v1206_v9, %v1205_v16 }
 0x51a   :  { %2456 = vtanh.f32 %v3149_v26 }
 0x524   :  { %v2457_v46 = vpop.eup %2456 }
 0x525   :  { %v1209_v30 = vmul.f32 %v2457_v46, %v1204_v44 }
 0x527   :  { %1275 = vmatmul.mubr.f32.vlgmr.msra.gmra.mrb[10].mxu0 %v1209_v30  ;;  %1346 = vmatmul.mubr.f32.vlgmr.msra.gmra.mrb[10].mxu1 %v1209_v30 }
 0x528   :  { %2243 = vmatpush1.bf16.msra.mxu0 %v2614_v10  ;;  %2275 = vmatpush1.bf16.msra.mxu1 %v2617_v14 }
 0x529   :  { %2245 = vmatprep.subr.bf16.mxu0 %v2621_v18  ;;  %2277 = vmatprep.subr.bf16.mxu1 %v2623_v19 }
 0x52a   :  { %1438 = vmatprep.mubr.f32.mxu0 %v3301_v55  ;;  %1509 = vmatprep.mubr.f32.mxu1 %v3301_v55 }
 0x52c   :  { %2247 = vmatpush1.bf16.msra.mxu0 %v2626_v23  ;;  %2279 = vmatpush1.bf16.msra.mxu1 %v2630_v27 }
 0x52d   :  { %2249 = vmatprep.subr.bf16.mxu0 %v2632_v28  ;;  %2281 = vmatprep.subr.bf16.mxu1 %v2634_v32 }
 0x530   :  { %2251 = vmatpush1.bf16.msra.mxu0 %v2637_v36  ;;  %2283 = vmatpush1.bf16.msra.mxu1 %v2641_v40 }
 0x531   :  { %2253 = vmatprep.subr.bf16.mxu0 %v2643_v41  ;;  %2285 = vmatprep.subr.bf16.mxu1 %v2646_v45 }
 0x534   :  { %2255 = vmatpush1.bf16.msra.mxu0 %v2649_v52  ;;  %2287 = vmatpush1.bf16.msra.mxu1 %v2653_v53 }
 0x535   :  { %2257 = vmatprep.subr.bf16.mxu0 %v2655_v54  ;;  %2289 = vmatprep.subr.bf16.mxu1 %v2658_v58 }
 0x538   :  { %2259 = vmatpush1.bf16.msra.mxu0 %v2661_v2  ;;  %2291 = vmatpush1.bf16.msra.mxu1 %v2665_v3 }
 0x539   :  { %2261 = vmatprep.subr.bf16.mxu0 %v2667_v4  ;;  %2293 = vmatprep.subr.bf16.mxu1 %v2670_v11 }
 0x53c   :  { %2263 = vmatpush1.bf16.msra.mxu0 %v2673_v20  ;;  %2295 = vmatpush1.bf16.msra.mxu1 %v2677_v24 }
 0x53d   :  { %2265 = vmatprep.subr.bf16.mxu0 %v2679_v25  ;;  %2297 = vmatprep.subr.bf16.mxu1 %v2688_v31 }
 0x540   :  { %2267 = vmatpush1.bf16.msra.mxu0 %v2691_v39  ;;  %2299 = vmatpush1.bf16.msra.mxu1 %v2695_v42 }
 0x541   :  { %2269 = vmatprep.subr.bf16.mxu0 %v2697_v43  ;;  %2301 = vmatprep.subr.bf16.mxu1 %v2700_v47 }
 0x544   :  { %2271 = vmatpush1.bf16.msra.mxu0 %v2703_v51  ;;  %2303 = vmatpush1.bf16.msra.mxu1 %v3302_v22 }
 0x545   :  { %2305 = vmatprep.subr.bf16.mxu0 %v3303_v34  ;;  %2337 = vmatprep.subr.bf16.mxu1 %v3304_v35 }
 0x5fa   :  { %v1276_v61 = vpop.f32.mrb[10].mxu0  ;;  %v1347_v21 = vpop.f32.mrb[10].mxu1 }
 0x5fb   :  { %v1352_v6 = vadd.f32 %v1276_v61, %v3323_v38  ;;  %v1354_v33 = vadd.f32 %v1347_v21, %v316_v56  ;;  %v1278_v1 = vpop.f32.mrb[11].mxu0  ;;  %v1349_v37 = vpop.f32.mrb[11].mxu1  ;;  %v1705_v38 = vld [vmem:[#allocation4 + $0x18] sm:$0xff] }
 0x5fc   :  { %v1353_v57 = vadd.f32 %v1278_v1, %v315_v49  ;;  %v1355_v34 = vadd.f32 %v1349_v37, %v317_v50  ;;  %v1704_v50 = vld [vmem:[#allocation4 + $0x10] sm:$0xff]  ;;  %v1707_v1 = vld [vmem:[#allocation4 + $0x28] sm:$0xff] }
 0x5fd   :  { %v1356_v59 = vmul.f32 0.5, %v1352_v6  ;;  %v2372_v6 = vpack.c.bf16 %v1705_v38, %v1704_v50 }
 0x5fe   :  { %v1360_v35 = vmul.f32 0.5, %v1353_v57  ;;  %v1365_v5 = vmul.f32 0.5, %v1355_v34  ;;  %v1708_v57 = vld [vmem:[#allocation4 + $0x30] sm:$0xff]  ;;  %v1709_v34 = vld [vmem:[#allocation4 + $0x38] sm:$0xff] }
 0x5ff   :  { %2458 = vtanh.f32 %v1356_v59  ;;  %v2378_v59 = vpack.c.bf16 %v1709_v34, %v1708_v57 }
 0x600   :  { %2460 = vtanh.f32 %v1360_v35  ;;  %v1710_v35 = vld [vmem:[#allocation4 + $0x40] sm:$0xff] }
 0x601   :  { %2462 = vtanh.f32 %v1354_v33  ;;  %v1706_v33 = vld [vmem:[#allocation4 + $0x20] sm:$0xff] }
 0x602   :  { %2464 = vtanh.f32 %v1365_v5  ;;  %v2375_v37 = vpack.c.bf16 %v1707_v1, %v1706_v33  ;;  %v1711_v5 = vld [vmem:[#allocation4 + $0x48] sm:$0xff] }
 0x609   :  { %v2459_v48 = vpop.eup %2458 }
 0x60a   :  { %v2461_v9 = vpop.eup %2460  ;;  %v1358_v16 = vmul.f32 0.5, %v2459_v48  ;;  %v2381_v48 = vpack.c.bf16 %v1711_v5, %v1710_v35 }
 0x60b   :  { %v1362_v29 = vmul.f32 0.5, %v2461_v9  ;;  %v2463_v44 = vpop.eup %2462  ;;  %v1712_v9 = vld [vmem:[#allocation4 + $0x50] sm:$0xff] }
 0x60c   :  { %v1359_v7 = vadd.f32 0.5, %v1358_v16  ;;  %v2465_v61 = vpop.eup %2464  ;;  %v1713_v16 = vld [vmem:[#allocation4 + $0x58] sm:$0xff] }
 0x60d   :  { %v1363_v46 = vadd.f32 0.5, %v1362_v29  ;;  %v1367_v21 = vmul.f32 0.5, %v2465_v61  ;;  %v2384_v29 = vpack.c.bf16 %v1713_v16, %v1712_v9  ;;  %v3325_v61 = vld [vmem:[#allocation31_spill] sm:$0xff] }
 0x60e   :  { %v1370_v30 = vmul.f32 %v2463_v44, %v1359_v7  ;;  %v1714_v7 = vld [vmem:[#allocation4 + $0x60] sm:$0xff]  ;;  %v1715_v44 = vld [vmem:[#allocation4 + $0x68] sm:$0xff] }
 0x60f   :  { %v1369_v60 = vmul.f32 %v1363_v46, %v3149_v26  ;;  %v1368_v13 = vadd.f32 0.5, %v1367_v21  ;;  %v2545_v26 = vmov 0.0|0.0   ;;  %v2387_v46 = vpack.c.bf16 %v1715_v44, %v1714_v7 }
 0x610   :  { %v324_v21 = vadd.f32 %v2946_v17, %v3325_v61 }
 0x611   :  { %v3194_v56 = vadd.f32 %v1370_v30, %v1369_v60  ;;  %v1716_v30 = vld [vmem:[#allocation4 + $0x70] sm:$0xff]  ;;  %v1717_v60 = vld [vmem:[#allocation4 + $0x78] sm:$0xff] }
 0x613   :  { %2466 = vtanh.f32 %v3194_v56 }
 0x61d   :  { %v2467_v49 = vpop.eup %2466 }
 0x61e   :  { %v1373_v8 = vmul.f32 %v2467_v49, %v1368_v13 }
 0x620   :  { %1439 = vmatmul.mubr.f32.vlgmr.msra.gmra.mrb[12].mxu0 %v1373_v8  ;;  %1510 = vmatmul.mubr.f32.vlgmr.msra.gmra.mrb[12].mxu1 %v1373_v8  ;;  %v3326_v8 = vld [vmem:[#allocation32_spill] sm:$0xff] }
 0x621   :  { %2307 = vmatpush1.bf16.msra.mxu0 %v2614_v10  ;;  %2339 = vmatpush1.bf16.msra.mxu1 %v2617_v14  ;;  %v320_v10 = vadd.f32 %v2946_v17, %v2902_v63 }
 0x622   :  { %2309 = vmatprep.subr.bf16.mxu0 %v2621_v18  ;;  %2341 = vmatprep.subr.bf16.mxu1 %v2623_v19  ;;  %v319_v19 = vadd.f32 %v2942_v15, %v2904_v0  ;;  %v1702_v0 = vld [vmem:[#allocation4] sm:$0xff] }
 0x623   :  { %1602 = vmatprep.mubr.f32.mxu0 %v3301_v55  ;;  %1673 = vmatprep.mubr.f32.mxu1 %v3301_v55 }
 0x625   :  { %2311 = vmatpush1.bf16.msra.mxu0 %v2626_v23  ;;  %2343 = vmatpush1.bf16.msra.mxu1 %v2630_v27  ;;  %v3324_v23 = vld [vmem:[#allocation30_spill] sm:$0xff] }
 0x626   :  { %2313 = vmatprep.subr.bf16.mxu0 %v2632_v28  ;;  %2345 = vmatprep.subr.bf16.mxu1 %v2634_v32  ;;  %v321_v27 = vadd.f32 %v2957_v12, %v3324_v23 }
 0x629   :  { %2315 = vmatpush1.bf16.msra.mxu0 %v2637_v36  ;;  %2347 = vmatpush1.bf16.msra.mxu1 %v2641_v40 }
 0x62a   :  { %2317 = vmatprep.subr.bf16.mxu0 %v2643_v41  ;;  %2349 = vmatprep.subr.bf16.mxu1 %v2646_v45 }
 0x62d   :  { %2319 = vmatpush1.bf16.msra.mxu0 %v2649_v52  ;;  %2351 = vmatpush1.bf16.msra.mxu1 %v2653_v53 }
 0x62e   :  { %2321 = vmatprep.subr.bf16.mxu0 %v2655_v54  ;;  %2353 = vmatprep.subr.bf16.mxu1 %v2658_v58 }
 0x631   :  { %2323 = vmatpush1.bf16.msra.mxu0 %v2661_v2  ;;  %2355 = vmatpush1.bf16.msra.mxu1 %v2665_v3 }
 0x632   :  { %2325 = vmatprep.subr.bf16.mxu0 %v2667_v4  ;;  %2357 = vmatprep.subr.bf16.mxu1 %v2670_v11 }
 0x635   :  { %2327 = vmatpush1.bf16.msra.mxu0 %v2673_v20  ;;  %2359 = vmatpush1.bf16.msra.mxu1 %v2677_v24 }
 0x636   :  { %2329 = vmatprep.subr.bf16.mxu0 %v2679_v25  ;;  %2361 = vmatprep.subr.bf16.mxu1 %v2688_v31 }
 0x639   :  { %2331 = vmatpush1.bf16.msra.mxu0 %v2691_v39  ;;  %2363 = vmatpush1.bf16.msra.mxu1 %v2695_v42 }
 0x63a   :  { %2333 = vmatprep.subr.bf16.mxu0 %v2697_v43  ;;  %2365 = vmatprep.subr.bf16.mxu1 %v2700_v47 }
 0x63d   :  { %2335 = vmatpush1.bf16.msra.mxu0 %v2703_v51  ;;  %2367 = vmatpush1.bf16.msra.mxu1 %v3302_v22 }
 0x63e   :  { %2368 = vmatprep.subr.bf16.mxu0 %v2545_v26 }
 0x6f3   :  { %v1440_v14 = vpop.f32.mrb[12].mxu0  ;;  %v1511_v18 = vpop.f32.mrb[12].mxu1 }
 0x6f4   :  { %v1516_v28 = vadd.f32 %v1440_v14, %v2917_v62  ;;  %v1518_v32 = vadd.f32 %v1511_v18, %v320_v10  ;;  %v1442_v36 = vpop.f32.mrb[13].mxu0  ;;  %v1513_v40 = vpop.f32.mrb[13].mxu1  ;;  %v1703_v62 = vld [vmem:[#allocation4 + $0x8] sm:$0xff]  ;;  %v323_v10 = vadd.f32 %v2942_v15, %v3326_v8 }
 0x6f5   :  { %v1517_v41 = vadd.f32 %v1442_v36, %v319_v19  ;;  %v1519_v45 = vadd.f32 %v1513_v40, %v321_v27  ;;  %v2369_v22 = vpack.c.bf16 %v1703_v62, %v1702_v0  ;;  %v3327_v14 = vld [vmem:[#allocation33_spill] sm:$0xff]  ;;  %v3328_v19 = vld [vmem:[#allocation34_spill] sm:$0xff] }
 0x6f6   :  { %v1520_v52 = vmul.f32 0.5, %v1516_v28  ;;  %v325_v18 = vadd.f32 %v2957_v12, %v3327_v14 }
 0x6f7   :  { %v1524_v53 = vmul.f32 0.5, %v1517_v41  ;;  %v1529_v54 = vmul.f32 0.5, %v1519_v45 }
 0x6f8   :  { %2468 = vtanh.f32 %v1520_v52 }
 0x6f9   :  { %2470 = vtanh.f32 %v1524_v53 }
 0x6fa   :  { %2472 = vtanh.f32 %v1518_v32 }
 0x6fb   :  { %2474 = vtanh.f32 %v1529_v54 }
 0x702   :  { %v2469_v58 = vpop.eup %2468 }
 0x703   :  { %v2471_v2 = vpop.eup %2470  ;;  %v1522_v3 = vmul.f32 0.5, %v2469_v58 }
 0x704   :  { %v1526_v4 = vmul.f32 0.5, %v2471_v2  ;;  %v2473_v20 = vpop.eup %2472 }
 0x705   :  { %v1523_v11 = vadd.f32 0.5, %v1522_v3  ;;  %v2475_v42 = vpop.eup %2474 }
 0x706   :  { %v1527_v24 = vadd.f32 0.5, %v1526_v4  ;;  %v1531_v43 = vmul.f32 0.5, %v2475_v42  ;;  %v1803_v42 = vld [vmem:[%s3260_s5] ss:$0 sm:$0xff] }
 0x707   :  { %v1534_v25 = vmul.f32 %v2473_v20, %v1523_v11 }
 0x708   :  { %v1533_v31 = vmul.f32 %v1527_v24, %v3194_v56  ;;  %v1532_v47 = vadd.f32 0.5, %v1531_v43  ;;  %v2390_v56 = vpack.c.bf16 %v1717_v60, %v1716_v30 }
 0x70a   :  { %v3237_v39 = vadd.f32 %v1534_v25, %v1533_v31 }
 0x70c   :  { %2476 = vtanh.f32 %v3237_v39 }
 0x716   :  { %v2477_v51 = vpop.eup %2476 }
 0x717   :  { %v1537_v63 = vmul.f32 %v2477_v51, %v1532_v47 }
 0x719   :  { %1603 = vmatmul.mubr.f32.vlgmr.msra.gmra.mrb[14].mxu0 %v1537_v63  ;;  %1674 = vmatmul.mubr.f32.vlgmr.msra.gmra.mrb[14].mxu1 %v1537_v63 }
 0x71a   :  { %2370 = vmatpush3.bf16.msra.mxu0 %v2369_v22  ;;  %1853 = vmatprep.mubr.msk.f32.mxu0 %vm2546_vm0, %v3301_v55 }
 0x71b   :  { %2371 = vmatprep.subr.bf16.mxu0 %v2545_v26 }
 0x71e   :  { %2373 = vmatpush3.bf16.msra.mxu0 %v2372_v6 }
 0x71f   :  { %2374 = vmatprep.subr.bf16.mxu0 %v2545_v26 }
 0x722   :  { %2376 = vmatpush3.bf16.msra.mxu0 %v2375_v37 }
 0x723   :  { %2377 = vmatprep.subr.bf16.mxu0 %v2545_v26 }
 0x726   :  { %2379 = vmatpush3.bf16.msra.mxu0 %v2378_v59 }
 0x727   :  { %2380 = vmatprep.subr.bf16.mxu0 %v2545_v26 }
 0x72a   :  { %2382 = vmatpush3.bf16.msra.mxu0 %v2381_v48 }
 0x72b   :  { %2383 = vmatprep.subr.bf16.mxu0 %v2545_v26 }
 0x72e   :  { %2385 = vmatpush3.bf16.msra.mxu0 %v2384_v29 }
 0x72f   :  { %2386 = vmatprep.subr.bf16.mxu0 %v2545_v26 }
 0x732   :  { %2388 = vmatpush3.bf16.msra.mxu0 %v2387_v46 }
 0x733   :  { %2389 = vmatprep.subr.bf16.mxu0 %v2545_v26 }
 0x736   :  { %2391 = vmatpush3.bf16.msra.mxu0 %v2390_v56 }
 0x7ec   :  { %v1604_v13 = vpop.f32.mrb[14].mxu0  ;;  %v1675_v49 = vpop.f32.mrb[14].mxu1 }
 0x7ed   :  { %v1680_v23 = vadd.f32 %v1604_v13, %v3328_v19  ;;  %v1682_v27 = vadd.f32 %v1675_v49, %v324_v21  ;;  %v1606_v28 = vpop.f32.mrb[15].mxu0  ;;  %v1677_v32 = vpop.f32.mrb[15].mxu1 }
 0x7ee   :  { %v1681_v36 = vadd.f32 %v1606_v28, %v323_v10  ;;  %v1683_v40 = vadd.f32 %v1677_v32, %v325_v18 }
 0x7ef   :  { %v1684_v41 = vmul.f32 0.5, %v1680_v23 }
 0x7f0   :  { %v1688_v55 = vmul.f32 0.5, %v1681_v36  ;;  %v1693_v17 = vmul.f32 0.5, %v1683_v40 }
 0x7f1   :  { %2478 = vtanh.f32 %v1684_v41 }
 0x7f2   :  { %2480 = vtanh.f32 %v1688_v55 }
 0x7f3   :  { %2482 = vtanh.f32 %v1682_v27 }
 0x7f4   :  { %2484 = vtanh.f32 %v1693_v17 }
 0x7fb   :  { %v2479_v45 = vpop.eup %2478 }
 0x7fc   :  { %v2481_v52 = vpop.eup %2480  ;;  %v1686_v53 = vmul.f32 0.5, %v2479_v45 }
 0x7fd   :  { %v1690_v15 = vmul.f32 0.5, %v2481_v52  ;;  %v2483_v12 = vpop.eup %2482 }
 0x7fe   :  { %v1687_v54 = vadd.f32 0.5, %v1686_v53  ;;  %v2485_v11 = vpop.eup %2484 }
 0x7ff   :  { %v1691_v58 = vadd.f32 0.5, %v1690_v15  ;;  %v1695_v20 = vmul.f32 0.5, %v2485_v11 }
 0x800   :  { %v1698_v2 = vmul.f32 %v2483_v12, %v1687_v54 }
 0x801   :  { %v1697_v3 = vmul.f32 %v1691_v58, %v3237_v39  ;;  %v1696_v24 = vadd.f32 0.5, %v1695_v20 }
 0x803   :  { %v1699_v4 = vadd.f32 %v1698_v2, %v1697_v3 }
 0x805   :  { %2486 = vtanh.f32 %v1699_v4 }
 0x80f   :  { %v2487_v25 = vpop.eup %2486 }
 0x810   :  { %v1701_v31 = vmul.f32 %v2487_v25, %v1696_v24 }
 0x812   :  { %1854 = vmatmul.mubr.f32.vlgmr.msra.gmra.mrb[16].mxu0 %v1701_v31 }
 0x8e5   :  { %v1791_v43 = vpop.f32.mrb[16].mxu0 }
 0x8e6   :  { %v1792_v47 = vadd.f32 %v1803_v42, %v1791_v43  ;;  %v1855_v51 = vpop.f32.mrb[17].mxu0 }
 0x8e8   :  { %1795 = vst [vmem:[%s3261_s6] sm:$0xff] %v1792_v47 }
 0x8e9   :  { %1800 = vsyncpa [#allocation3], 1 }
 0x8ea   :  { %1801 = vsyncpa [#allocation5], 1 }

</bundles_post_ra>
